<compile_context>
chip_gen: v7x
topology: tpu7x:2x2x1
jax: 0.10.0
libtpu: 0.0.40
codegen_flags: <defaults>
</compile_context>

<pallas_src>
import functools

import jax
import jax.numpy as jnp
from jax.experimental import pallas as pl
from jax.experimental.pallas import tpu as pltpu

_LANE = 128
_NEG_BIG = -1e30


def _round_up(v, m):
    return ((v + m - 1) // m) * m


def _row_tile(n_p, max_tile=1024):
    # Largest multiple-of-128 divisor of n_p, capped, keeping >= 2 row tiles
    # (v7x has 2 TensorCores; a single 'parallel' tile would idle one of them).
    for c in (1024, 512, 256, 128):
        if c <= max_tile and n_p % c == 0 and (n_p // c >= 2 or n_p == 128):
            return c
    return 128


def _choose_agg_tiles(n_p, rhs_cols, out_cols, out_itemsize, rhs_resident,
                      budget=24 << 20):
    """Pick (tm, tk) maximizing tile area under a conservative VMEM budget.

    Per-grid-step fixed overhead is ~0.35 us while a 256x256 bf16 A-tile only
    carries ~36-170 ns of MXU work, so tiles of 512-1024 are preferred whenever
    VMEM allows.  The budget assumes double-buffered inputs/outputs and keeps
    the working set well inside v7x's 64 MiB physical VMEM.
    """
    def est(tm, tk):
        a_b = 2 * tm * tk                                    # int8 A, 2 bufs
        rhs_b = (2 * n_p * rhs_cols * 2 if rhs_resident
                 else 2 * tk * rhs_cols * 2)                 # bf16 RHS
        acc_b = tm * rhs_cols * 4                            # f32 accumulator
        out_b = 2 * tm * out_cols * out_itemsize
        return a_b + rhs_b + acc_b + out_b + (2 << 20)       # + weights slack

    cands = [c for c in (1024, 512, 256, 128) if n_p % c == 0] or [n_p]
    best = None
    for tm in cands:
        if n_p // tm < 2 and n_p > 128:
            continue          # keep >= 2 'parallel' row tiles (v7x dual-TC)
        for tk in cands:
            e = est(tm, tk)
            if e > budget:
                continue
            score = (tm * tk, tk)
            if best is None or score > best[0]:
                best = (score, tm, tk, e)
    if best is None:
        tm = tk = cands[-1]
        return tm, tk, est(tm, tk)
    return best[1], best[2], best[3]


# ---------------------------------------------------------------------------
# Kernel 1: row-tiled feature transform  H = X @ W^T  (only when hidden <= input)
# ---------------------------------------------------------------------------
def _xform_kernel(x_ref, wt_ref, h_ref):
    h = jnp.dot(x_ref[...], wt_ref[...], preferred_element_type=jnp.float32)
    h_ref[...] = h.astype(h_ref.dtype)


def _feature_transform(x, wt):
    n_p, d_p = x.shape
    o_p = wt.shape[1]
    tm = _row_tile(n_p, max_tile=512)
    return pl.pallas_call(
        _xform_kernel,
        out_shape=jax.ShapeDtypeStruct((n_p, o_p), jnp.bfloat16),
        grid=(n_p // tm,),
        in_specs=[pl.BlockSpec((tm, d_p), lambda i: (i, 0)),
                  pl.BlockSpec((d_p, o_p), lambda i: (0, 0))],
        out_specs=pl.BlockSpec((tm, o_p), lambda i: (i, 0)),
        compiler_params=pltpu.CompilerParams(
            dimension_semantics=("parallel",)),
    )(x, wt)


# ---------------------------------------------------------------------------
# Kernel 2: generic tiled aggregation with fused finalize:
#   acc = A @ RHS  (over k tiles, int8 A upcast -> bf16 MXU, f32 accumulator)
#   finalize:
#     y = acc * (1/deg)
#     [y = y @ W_post^T]          (layer weight when aggregation ran over X)
#     y = y + bias ; [relu]
#     [y = y @ W2^T]              (layer-2 pre-transform fused into layer 1)
#     [y = masked log_softmax(y)] (fused into the last layer)
# ---------------------------------------------------------------------------
def _agg_kernel(a_ref, rhs_ref, w_post_ref, w_pre2_ref, bias_ref, deg_ref,
                out_ref, acc_ref, *, tk, rhs_resident, apply_w_post,
                apply_relu, apply_w_pre2, apply_logsoftmax, valid_cols):
    k = pl.program_id(1)

    @pl.when(k == 0)
    def _():
        acc_ref[...] = jnp.zeros_like(acc_ref)

    # A stored int8 in HBM (half the O(N^2) read bytes); upcast on the VPU.
    a_tile = a_ref[...].astype(jnp.float32).astype(jnp.bfloat16)
    if rhs_resident:
        off = pl.multiple_of(k * tk, tk)
        rhs_tile = rhs_ref[pl.ds(off, tk), :]
    else:
        rhs_tile = rhs_ref[...]
    acc_ref[...] += jnp.dot(a_tile, rhs_tile,
                            preferred_element_type=jnp.float32)

    @pl.when(k == pl.num_programs(1) - 1)
    def _():
        # Exact divide (feeds a second matmul + log_softmax downstream).
        inv_deg = 1.0 / jnp.maximum(deg_ref[...], 1.0)
        y = acc_ref[...] * inv_deg
        if apply_w_post:
            y = jnp.dot(y.astype(jnp.bfloat16), w_post_ref[...],
                        preferred_element_type=jnp.float32)
        y = y + bias_ref[...]
        if apply_relu:
            y = jnp.maximum(y, 0.0)
        if apply_w_pre2:
            y = jnp.dot(y.astype(jnp.bfloat16), w_pre2_ref[...],
                        preferred_element_type=jnp.float32)
        if apply_logsoftmax:
            col = jax.lax.broadcasted_iota(jnp.int32, y.shape, 1)
            valid = col < valid_cols
            m = jnp.max(jnp.where(valid, y, _NEG_BIG), axis=-1, keepdims=True)
            e = jnp.where(valid, jnp.exp(y - m), 0.0)
            lse = jnp.log(jnp.sum(e, axis=-1, keepdims=True))
            y = y - m - lse
        out_ref[...] = y.astype(out_ref.dtype)


def _aggregate(a, rhs, deg, bias, *, w_post=None, w_pre2=None, apply_relu,
               apply_logsoftmax=False, valid_cols=0, out_dtype):
    n_p = a.shape[0]
    rhs_cols = rhs.shape[1]
    out_cols = rhs_cols
    if w_post is not None:
        out_cols = w_post.shape[1]
    if w_pre2 is not None:
        out_cols = w_pre2.shape[1]
    out_itemsize = jnp.dtype(out_dtype).itemsize

    # RHS resident in VMEM (loaded once, not re-streamed per row tile) when it
    # fits the budget; otherwise stream (tk, cols) tiles.
    rhs_resident = (2 * n_p * rhs_cols * 2) <= (12 << 20)
    tm, tk, est = _choose_agg_tiles(n_p, rhs_cols, out_cols, out_itemsize,
                                    rhs_resident)

    dummy = jnp.zeros((8, _LANE), jnp.bfloat16)
    w_post_arr = dummy if w_post is None else w_post
    w_pre2_arr = dummy if w_pre2 is None else w_pre2

    kernel = functools.partial(
        _agg_kernel, tk=tk, rhs_resident=rhs_resident,
        apply_w_post=w_post is not None, apply_relu=apply_relu,
        apply_w_pre2=w_pre2 is not None,
        apply_logsoftmax=apply_logsoftmax, valid_cols=valid_cols)

    if rhs_resident:
        rhs_spec = pl.BlockSpec((n_p, rhs_cols), lambda i, k: (0, 0))
    else:
        rhs_spec = pl.BlockSpec((tk, rhs_cols), lambda i, k: (k, 0))

    cp_kwargs = dict(dimension_semantics=("parallel", "arbitrary"))
    if est > (14 << 20):   # above the smallest default scoped limit (v5e)
        cp_kwargs["vmem_limit_bytes"] = int(
            min(max(est + (8 << 20), 32 << 20), 48 << 20))

    return pl.pallas_call(
        kernel,
        out_shape=jax.ShapeDtypeStruct((n_p, out_cols), out_dtype),
        grid=(n_p // tm, n_p // tk),
        in_specs=[
            pl.BlockSpec((tm, tk), lambda i, k: (i, k)),            # A (int8)
            rhs_spec,                                               # RHS
            pl.BlockSpec(w_post_arr.shape, lambda i, k: (0, 0)),    # W_post^T
            pl.BlockSpec(w_pre2_arr.shape, lambda i, k: (0, 0)),    # W2^T (pre)
            pl.BlockSpec((1, bias.shape[1]), lambda i, k: (0, 0)),  # bias row
            pl.BlockSpec((tm, 1), lambda i, k: (i, 0)),             # deg column
        ],
        out_specs=pl.BlockSpec((tm, out_cols), lambda i, k: (i, 0)),
        scratch_shapes=[pltpu.VMEM((tm, rhs_cols), jnp.float32)],
        compiler_params=pltpu.CompilerParams(**cp_kwargs),
    )(a, rhs, w_post_arr, w_pre2_arr, bias, deg)


# ---------------------------------------------------------------------------
# JAX glue: graph operands, weight padding, network wrapper.
# ---------------------------------------------------------------------------
def prepare_graph(edge_index, num_nodes):
    """Dense int8 edge-count matrix A (A[i,j] = #edges j -> i) + in-degree column.

    O(N^2) scatter work: build ONCE per graph and pass via graph= to reuse
    across forward calls (hoisted off the steady-state critical path).
    """
    n_p = _round_up(num_nodes, _LANE)
    src = edge_index[0].astype(jnp.int32)
    dst = edge_index[1].astype(jnp.int32)
    counts = jnp.zeros((n_p, n_p), jnp.int32).at[dst, src].add(1)
    # TODO(synk): int8 edge counts saturate at 127 parallel edges per (dst, src)
    # pair; fall back to bf16 A for dense multigraphs.
    a = counts.astype(jnp.int8)
    deg = jnp.zeros((n_p,), jnp.float32).at[dst].add(1.0).reshape(n_p, 1)
    return a, deg


def _pad_weights(w, b, d_p):
    o, d = w.shape
    o_p = _round_up(o, _LANE)
    wt = jnp.zeros((d_p, o_p), jnp.bfloat16).at[:d, :o].set(
        w.T.astype(jnp.bfloat16))
    bp = jnp.zeros((1, o_p), jnp.float32).at[0, :o].set(b.astype(jnp.float32))
    return wt, bp, o_p


def graph_sage_nn_v4(x, edge_index, w1, b1, w2, b2, pool_method="mean",
                     graph=None):
    """GraphSageNNV4 forward (eval mode):

        y = log_softmax(layer2(relu(layer1(x, A)), A), axis=1)

    x: [N, D_in] f32, edge_index: [2, E] int32,
    w1: [H, D_in], b1: [H], w2: [O, H], b2: [O].
    """
    assert pool_method == "mean", "only 'mean' pooling implemented"

    n, d_in = x.shape
    out_dim = w2.shape[0]

    n_p = _round_up(n, _LANE)
    d_p = _round_up(d_in, _LANE)

    if graph is None:
        graph = prepare_graph(edge_index, n)
    a, deg = graph

    x_pad = jnp.zeros((n_p, d_p), jnp.bfloat16).at[:n, :d_in].set(
        x.astype(jnp.bfloat16))

    w1t, b1p, h_p = _pad_weights(w1, b1, d_p)
    w2t, b2p, o2_p = _pad_weights(w2, b2, h_p)

    # Layer-2 feature transform folds into layer-1's finalize when O <= H
    # (diag(1/deg) A z1 W2^T == diag(1/deg) A (z1 W2^T)).
    fuse_w2 = o2_p <= h_p

    # ---- layer 1 (+ fused layer-2 pre-transform) ----
    if h_p <= d_p:
        # Reassociate: h1 = x @ W1^T first so the O(N^2) matmul contracts over H.
        h1 = _feature_transform(x_pad, w1t)
        l1 = _aggregate(a, h1, deg, b1p, w_post=None,
                        w_pre2=w2t if fuse_w2 else None,
                        apply_relu=True, out_dtype=jnp.bfloat16)
    else:
        # Aggregate over the (smaller) D axis; apply W1^T in the finalize.
        l1 = _aggregate(a, x_pad, deg, b1p, w_post=w1t,
                        w_pre2=w2t if fuse_w2 else None,
                        apply_relu=True, out_dtype=jnp.bfloat16)

    # ---- layer 2 aggregation + bias + masked log_softmax (all fused) ----
    y = _aggregate(a, l1, deg, b2p,
                   w_post=None if fuse_w2 else w2t,
                   w_pre2=None, apply_relu=False,
                   apply_logsoftmax=True, valid_cols=out_dim,
                   out_dtype=jnp.float32)
    return y[:n, :out_dim]


# ---------------------------------------------------------------------------
# Plain-JAX reference mirroring the PyTorch module (mean pooling, eval mode).
# ---------------------------------------------------------------------------
def _reference(x, edge_index, w1, b1, w2, b2):
    src, dst = edge_index[0], edge_index[1]
    n = x.shape[0]

    def layer(h, w, b):
        sums = jnp.zeros((n, h.shape[1]), jnp.float32).at[dst].add(h[src])
        cnt = jnp.zeros((n,), jnp.float32).at[dst].add(1.0)
        mean = sums / jnp.maximum(cnt, 1.0)[:, None]
        return mean @ w.T + b

    h = jax.nn.relu(layer(x, w1, b1))
    z = layer(h, w2, b2)
    return jax.nn.log_softmax(z, axis=1)


if __name__ == "__main__":
    # Small but tile-exercising problem: 512 nodes, 2048 edges, 64 -> 256 -> 16.
    N, E = 512, 2048
    D_IN, HIDDEN, OUT = 64, 256, 16

    key = jax.random.PRNGKey(0)
    kx, ks, kd, kw1, kb1, kw2, kb2 = jax.random.split(key, 7)

    x = jax.random.normal(kx, (N, D_IN), dtype=jnp.float32)
    src = jax.random.randint(ks, (E,), 0, N, dtype=jnp.int32)
    dst = jax.random.randint(kd, (E,), 0, N, dtype=jnp.int32)
    edge_index = jnp.stack([src, dst], axis=0)                   # [2, E]

    def linear_init(kw, kb, out_d, in_d):
        # nn.Linear-style deterministic init: weight [out, in], bias [out].
        bound = 1.0 / (in_d ** 0.5)
        w = jax.random.uniform(kw, (out_d, in_d), jnp.float32, -bound, bound)
        b = jax.random.uniform(kb, (out_d,), jnp.float32, -bound, bound)
        return w, b

    w1, b1 = linear_init(kw1, kb1, HIDDEN, D_IN)
    w2, b2 = linear_init(kw2, kb2, OUT, HIDDEN)

    # Graph operands built once (cacheable across forward calls).
    graph = jax.tree.map(jax.block_until_ready, prepare_graph(edge_index, N))

    y = graph_sage_nn_v4(x, edge_index, w1, b1, w2, b2,
                         pool_method="mean", graph=graph)
    y = jax.block_until_ready(y)

    y_ref = _reference(x, edge_index, w1, b1, w2, b2)
    assert y.shape == (N, OUT)
    max_err = jnp.max(jnp.abs(y - y_ref))
    assert jnp.allclose(y, y_ref, atol=2e-2, rtol=2e-2), (
        f"mismatch vs reference (max abs err {max_err})")

    print("KERNEL_OK")
</pallas_src>

<mosaic_0001>
module attributes {stable_mosaic.version = 11 : i64} {
  func.func @_agg_kernel(%arg0: i32, %arg1: i32, %arg2: memref<256x512xi8, #tpu.memory_space<vmem>>, %arg3: memref<512x128xbf16, #tpu.memory_space<vmem>>, %arg4: memref<128x256xbf16, #tpu.memory_space<vmem>>, %arg5: memref<256x128xbf16, #tpu.memory_space<vmem>>, %arg6: memref<1x256xf32, #tpu.memory_space<vmem>>, %arg7: memref<256x1xf32, #tpu.memory_space<vmem>>, %arg8: memref<256x128xbf16, #tpu.memory_space<vmem>>, %arg9: memref<256x128xf32, #tpu.memory_space<vmem>>) attributes {dimension_semantics = [#tpu.dimension_semantics<parallel>, #tpu.dimension_semantics<arbitrary>], iteration_bounds = array<i64: 2, 1>, scalar_prefetch = 0 : i64, scratch_operands = 1 : i64, tpu.core_type = #tpu.core_type<tc>, window_params = [{transform_indices = @transform_0, window_bounds = array<i64: 256, 512>}, {pipeline_mode = #tpu.pipeline_mode<synchronous>, transform_indices = @transform_1, window_bounds = array<i64: 512, 128>}, {pipeline_mode = #tpu.pipeline_mode<synchronous>, transform_indices = @transform_2, window_bounds = array<i64: 128, 256>}, {pipeline_mode = #tpu.pipeline_mode<synchronous>, transform_indices = @transform_3, window_bounds = array<i64: 256, 128>}, {pipeline_mode = #tpu.pipeline_mode<synchronous>, transform_indices = @transform_4, window_bounds = array<i64: 1, 256>}, {transform_indices = @transform_5, window_bounds = array<i64: 256, 1>}, {transform_indices = @transform_6, window_bounds = array<i64: 256, 128>}]} {
    %c0_i32 = arith.constant 0 : i32
    %0 = arith.cmpi eq, %arg1, %c0_i32 : i32
    %1 = arith.extui %0 : i1 to i32
    %c0_i32_0 = arith.constant 0 : i32
    %2 = arith.cmpi ne, %1, %c0_i32_0 : i32
    scf.if %2 {
      %cst_9 = arith.constant 0.000000e+00 : f32
      %17 = vector.broadcast %cst_9 : f32 to vector<256x128xf32>
      %c0_10 = arith.constant 0 : index
      %c0_11 = arith.constant 0 : index
      %18 = vector.load %arg9[%c0_10, %c0_11] : memref<256x128xf32, #tpu.memory_space<vmem>>, vector<256x128xf32>
      tpu.vector_store %arg9[%c0_10, %c0_11], %17 {strides = array<i32>} : memref<256x128xf32, #tpu.memory_space<vmem>>, vector<256x128xf32>,
    } else {
    }
    %c0 = arith.constant 0 : index
    %c0_1 = arith.constant 0 : index
    %3 = vector.load %arg2[%c0, %c0_1] : memref<256x512xi8, #tpu.memory_space<vmem>>, vector<256x512xi8>
    %4 = arith.sitofp %3 : vector<256x512xi8> to vector<256x512xf32>
    %5 = arith.truncf %4 : vector<256x512xf32> to vector<256x512xbf16>
    %c512_i32 = arith.constant 512 : i32
    %6 = arith.muli %arg1, %c512_i32 : i32
    %7 = tpu.assume_multiple %6, 512 : i32
    %8 = arith.index_cast %7 : i32 to index
    %c0_2 = arith.constant 0 : index
    %9 = vector.load %arg3[%8, %c0_2] : memref<512x128xbf16, #tpu.memory_space<vmem>>, vector<512x128xbf16>
    %c0_3 = arith.constant 0 : index
    %c0_4 = arith.constant 0 : index
    %10 = vector.load %arg9[%c0_3, %c0_4] : memref<256x128xf32, #tpu.memory_space<vmem>>, vector<256x128xf32>
    %cst = arith.constant dense<0.000000e+00> : vector<256x128xf32>
    %11 = tpu.matmul %5, %9, %cst {dimension_numbers = #tpu.dot_dimension_numbers<[1], [0], [0], [1], [0, 0, 1, 1], [], []>} : vector<256x512xbf16>, vector<512x128xbf16>, vector<256x128xf32> -> vector<256x128xf32>
    %12 = arith.addf %10, %11 : vector<256x128xf32>
    %c0_5 = arith.constant 0 : index
    %c0_6 = arith.constant 0 : index
    %13 = vector.load %arg9[%c0_5, %c0_6] : memref<256x128xf32, #tpu.memory_space<vmem>>, vector<256x128xf32>
    tpu.vector_store %arg9[%c0_5, %c0_6], %12 {strides = array<i32>} : memref<256x128xf32, #tpu.memory_space<vmem>>, vector<256x128xf32>,
    %c0_i32_7 = arith.constant 0 : i32
    %14 = arith.cmpi eq, %arg1, %c0_i32_7 : i32
    %15 = arith.extui %14 : i1 to i32
    %c0_i32_8 = arith.constant 0 : i32
    %16 = arith.cmpi ne, %15, %c0_i32_8 : i32
    scf.if %16 {
      %c0_9 = arith.constant 0 : index
      %c0_10 = arith.constant 0 : index
      %17 = vector.load %arg7[%c0_9, %c0_10] : memref<256x1xf32, #tpu.memory_space<vmem>>, vector<256x1xf32>
      %cst_11 = arith.constant 1.000000e+00 : f32
      %18 = vector.broadcast %cst_11 : f32 to vector<256x1xf32>
      %19 = arith.maximumf %17, %18 : vector<256x1xf32>
      %cst_12 = arith.constant 1.000000e+00 : f32
      %20 = vector.broadcast %cst_12 : f32 to vector<256x1xf32>
      %21 = arith.divf %20, %19 : vector<256x1xf32>
      %c0_13 = arith.constant 0 : index
      %c0_14 = arith.constant 0 : index
      %22 = vector.load %arg9[%c0_13, %c0_14] : memref<256x128xf32, #tpu.memory_space<vmem>>, vector<256x128xf32>
      %23 = vector.broadcast %21 : vector<256x1xf32> to vector<256x128xf32>
      %24 = arith.mulf %22, %23 : vector<256x128xf32>
      %25 = arith.truncf %24 : vector<256x128xf32> to vector<256x128xbf16>
      %c0_15 = arith.constant 0 : index
      %c0_16 = arith.constant 0 : index
      %26 = vector.load %arg4[%c0_15, %c0_16] : memref<128x256xbf16, #tpu.memory_space<vmem>>, vector<128x256xbf16>
      %cst_17 = arith.constant dense<0.000000e+00> : vector<256x256xf32>
      %27 = tpu.matmul %25, %26, %cst_17 {dimension_numbers = #tpu.dot_dimension_numbers<[1], [0], [0], [1], [0, 0, 1, 1], [], []>} : vector<256x128xbf16>, vector<128x256xbf16>, vector<256x256xf32> -> vector<256x256xf32>
      %c0_18 = arith.constant 0 : index
      %c0_19 = arith.constant 0 : index
      %28 = vector.load %arg6[%c0_18, %c0_19] : memref<1x256xf32, #tpu.memory_space<vmem>>, vector<1x256xf32>
      %29 = vector.broadcast %28 : vector<1x256xf32> to vector<256x256xf32>
      %30 = arith.addf %27, %29 : vector<256x256xf32>
      %cst_20 = arith.constant 0.000000e+00 : f32
      %31 = vector.broadcast %cst_20 : f32 to vector<256x256xf32>
      %32 = arith.maximumf %30, %31 : vector<256x256xf32>
      %33 = arith.truncf %32 : vector<256x256xf32> to vector<256x256xbf16>
      %c0_21 = arith.constant 0 : index
      %c0_22 = arith.constant 0 : index
      %34 = vector.load %arg5[%c0_21, %c0_22] : memref<256x128xbf16, #tpu.memory_space<vmem>>, vector<256x128xbf16>
      %cst_23 = arith.constant dense<0.000000e+00> : vector<256x128xf32>
      %35 = tpu.matmul %33, %34, %cst_23 {dimension_numbers = #tpu.dot_dimension_numbers<[1], [0], [0], [1], [0, 0, 1, 1], [], []>} : vector<256x256xbf16>, vector<256x128xbf16>, vector<256x128xf32> -> vector<256x128xf32>
      %36 = arith.truncf %35 : vector<256x128xf32> to vector<256x128xbf16>
      %c0_24 = arith.constant 0 : index
      %c0_25 = arith.constant 0 : index
      %37 = vector.load %arg8[%c0_24, %c0_25] : memref<256x128xbf16, #tpu.memory_space<vmem>>, vector<256x128xbf16>
      tpu.vector_store %arg8[%c0_24, %c0_25], %36 {strides = array<i32>} : memref<256x128xbf16, #tpu.memory_space<vmem>>, vector<256x128xbf16>,
    } else {
    }
    return
  }
  func.func @transform_0(%arg0: i32, %arg1: i32) -> (i32, i32) {
    %c0_i32 = arith.constant 0 : i32
    return %arg0, %arg1 : i32, i32
  }
  func.func @transform_1(%arg0: i32, %arg1: i32) -> (i32, i32) {
    %c0_i32 = arith.constant 0 : i32
    %c0_i32_0 = arith.constant 0 : i32
    %c0_i32_1 = arith.constant 0 : i32
    return %c0_i32, %c0_i32_0 : i32, i32
  }
  func.func @transform_2(%arg0: i32, %arg1: i32) -> (i32, i32) {
    %c0_i32 = arith.constant 0 : i32
    %c0_i32_0 = arith.constant 0 : i32
    %c0_i32_1 = arith.constant 0 : i32
    return %c0_i32, %c0_i32_0 : i32, i32
  }
  func.func @transform_3(%arg0: i32, %arg1: i32) -> (i32, i32) {
    %c0_i32 = arith.constant 0 : i32
    %c0_i32_0 = arith.constant 0 : i32
    %c0_i32_1 = arith.constant 0 : i32
    return %c0_i32, %c0_i32_0 : i32, i32
  }
  func.func @transform_4(%arg0: i32, %arg1: i32) -> (i32, i32) {
    %c0_i32 = arith.constant 0 : i32
    %c0_i32_0 = arith.constant 0 : i32
    %c0_i32_1 = arith.constant 0 : i32
    return %c0_i32, %c0_i32_0 : i32, i32
  }
  func.func @transform_5(%arg0: i32, %arg1: i32) -> (i32, i32) {
    %c0_i32 = arith.constant 0 : i32
    %c0_i32_0 = arith.constant 0 : i32
    return %arg0, %c0_i32 : i32, i32
  }
  func.func @transform_6(%arg0: i32, %arg1: i32) -> (i32, i32) {
    %c0_i32 = arith.constant 0 : i32
    %c0_i32_0 = arith.constant 0 : i32
    return %arg0, %c0_i32 : i32, i32
  }
}

</mosaic_0001>

<bundles_post_ra>
// kernel: tpu_custom_call.1
= control target key start
LH: loop header
LB: loop body
LE: loop exit
PB: predicated region body
PF: predicated region fallthrough
CT: control target
= control target key end

     0   :  { %s3960_s0 = inlined_call_operand.vmem [shape: s8[512,512], index: 0, kind: input, shape index: {}]   ;;  %s3961_s1 = inlined_call_operand.hbm [shape: bf16[512,128], index: 1, kind: input, shape index: {}]   ;;  %s3962_s2 = inlined_call_operand.hbm [shape: bf16[128,256], index: 2, kind: input, shape index: {}]   ;;  %s3963_s3 = inlined_call_operand.hbm [shape: bf16[256,128], index: 3, kind: input, shape index: {}]   ;;  %s3964_s4 = inlined_call_operand.vmem [shape: f32[1,256], index: 4, kind: input, shape index: {}]   ;;  %s3965_s5 = inlined_call_operand.vmem [shape: f32[512,1], index: 5, kind: input, shape index: {}]   ;;  %s3966_s6 = inlined_call_operand.hbm [shape: bf16[512,128], index: 6, kind: output, shape index: {}]  }
   0x1   :  { %3973 = sst [smem:[#allocation16_spill]] %s3962_s2 }
   0x2   :  { %11 = vsyncpa [#allocation4], 0 }
   0x3   :  { %12 = vsyncpa [#allocation7], 0 }
   0x4   :  { %13 = vsyncpa [#allocation5], 0 }
   0x5   :  { %15 = vsyncpa [#allocation5 + $0x1], 0  ;;  %s3546_s21 = smov 0   ;;  %s3548_s22 = smov 0  }
   0x6   :  { %s3550_s23 = smov 0   ;;  %s3552_s24 = smov 0  }
   0x7   :  { %s3554_s25 = smov 0   ;;  %s3556_s26 = smov 0  }
   0x8 LB: > { %3974 = sst [smem:[#allocation13_spill]] %s3494_s25  ;;  %s2514_s27 = sadd.s32 4294967295, %s3498_s26   ;;  %s3498_s26 = sphi %s3556_s26, %s21_s26   ;;  %s3494_s25 = sphi %s3554_s25, %s3990_s25   ;;  %s3490_s24 = sphi %s3552_s24, %s3989_s24   ;;  %s3486_s23 = sphi %s3550_s23, %s3993_s23   ;;  %s3482_s22 = sphi %s3548_s22, %s3992_s22   ;;  %s3478_s21 = sphi %s3546_s21, %s3991_s21  }
   0x9   : > { %s2515_s28 = sadd.s32 4294967294, %s3498_s26   ;;  %s33_s29 = sadd.s32 1, %s3494_s25 }
   0xa   : > { %s178_s30 = sadd.s32 1, %s3486_s23  ;;  %p35_p0 = scmp.ge.s32.totalorder %s33_s29, 2 }
   0xb   : > { %p188_p1 = scmp.ne.s32.totalorder %s3486_s23, %s3482_s22  ;;  %p189_p2 = scmp.eq.s32.totalorder %s2514_s27, 1 }
   0xc   : > { %p194_p3 = scmp.ne.s32.totalorder %s3482_s22, %s3478_s21  ;;  %s3995_s29 = smov (%p35_p0, %s33_s29), 0 }
   0xd   : > { %3975 = sst [smem:[#allocation14_spill]] %s3995_s29  ;;  %p3586_p4 = por %p189_p2, %p188_p1 }
   0xe   : > { %p195_p5 = scmp.eq.s32.totalorder %s2515_s28, 1  ;;  %s175_s8 = ssub.s32 %s3494_s25, %s3995_s29 }
   0xf   : > { %s3976_s7 = scalar_select %p3586_p4, 1, 0 }
  0x10   : > { %p2516_p6 = scmp.ge.s32.totalorder %s3498_s26, 1  ;;  %p176_p7 = scmp.eq.s32.totalorder %s175_s8, 0 }
  0x11   : > { %p3593_p8 = por %p195_p5, %p194_p3  ;;  %p202_p9 = scmp.lt.s32.totalorder %s3498_s26, 3 }
  0x12   : > { %s3599_s10 = scalar_select %p176_p7, %s3486_s23, %s178_s30  }
  0x13   : > { %s3977_s9 = scalar_select %p3593_p8, 1, 0 }
  0x14   : > { %3978 = sst [smem:[#allocation15_spill]] %s3599_s10  ;;  %p3601_p10 = pnand %p2516_p6, %p202_p9 }
  0x15   : > { %p3605_p11 = scmp.eq.s32.totalorder %s2514_s27, 0  ;;  %s3500_s13 = smov [#allocation6]  }
  0x16   : > { %s3979_s11 = scalar_select %p3601_p10, 1, 0 }
  0x17   : > { %s3980_s12 = scalar_select %p3605_p11, 1, 0 }
  0x18   : > { %p3111_p12 = pneg %p3601_p10  ;;  %s227_s14 = sshll.u32 %s3500_s13, 4  ;;  %s228_s14 = int_to_ptr.vmem [resolvable:$true] %s227_s14 }
  0x19   : > { %s3501_s16 = smov [#allocation3]   ;;  %s3982_s2 = sld [smem:[#allocation16_spill]] }
  0x1a   : > { %p3613_p13 = pnand %p3605_p11, %p3111_p12  ;;  %s214_s17 = sshll.u32 %s3501_s16, 4  ;;  %s215_s17 = int_to_ptr.vmem [resolvable:$true] %s214_s17 }
  0x1c   : > { %p3625_p1 = pneg %p3613_p13 }
  0x1f   : > { %s3328_s20 = scalar_lea.hbm %s3982_s2, 2048 }
  0x20   : > { %p3329_p0 = scmp.ne.s32.totalorder %s3982_s2, %s3328_s20  ;;  %p3335_p5 = scmp.lt.u32.totalorder %s3328_s20, %s3982_s2 }
  0x22   : > { %p3331_p2 = pnand %p3625_p1, %p3329_p0 }
  0x24   : > { %p3332_p3 = pneg %p3331_p2 }
  0x26   : > { %p3337_p6 = pnand %p3335_p5, %p3332_p3 }
  0x28   : > { %3340 = shalt.err (!%p3337_p6)
}
  0x29   : > { %s3341_s16 = scalar_lea.vmem %s228_s14, 2048  ;;  %p3349_p8 = scmp.lt.s32.totalorder %s228_s14, %s228_s14 }
  0x2a   : > { %p3342_p7 = scmp.ne.s32.totalorder %s228_s14, %s3341_s16  ;;  %p3350_p4 = scmp.lt.s32.totalorder %s3341_s16, %s3341_s16 }
  0x2c   : > { %p3344_p9 = pnand %p3342_p7, %p3625_p1  ;;  %p3351_p11 = por %p3350_p4, %p3349_p8 }
  0x2e   : > { %p3345_p12 = pneg %p3344_p9 }
  0x30   : > { %p3352_p10 = pnand %p3351_p11, %p3345_p12 }
  0x32   : > { %3355 = shalt.err (!%p3352_p10)
}
  0x33   : > { %s3502_s18 = smov 128   ;;  %s3503_s19 = smov 8  }
  0x34   : > { %3117 = dma.hbm_to_vmem [thread:$0]  (!%p3613_p13), %s3982_s2, 2048, %s228_s14, [#allocation7], %s3502_s18, %s3502_s18, %s3503_s19  }
  0x35   : > { %s3356_s13 = scalar_lea.hbm %s3961_s1, 4096 }
  0x36   : > { %p3357_p4 = scmp.ne.s32.totalorder %s3961_s1, %s3356_s13  ;;  %p3363_p11 = scmp.lt.u32.totalorder %s3356_s13, %s3961_s1 }
  0x38   : > { %p3359_p8 = pnand %p3357_p4, %p3625_p1 }
  0x3a   : > { %p3360_p10 = pneg %p3359_p8 }
  0x3c   : > { %p3365_p0 = pnand %p3363_p11, %p3360_p10 }
  0x3e   : > { %3368 = shalt.err (!%p3365_p0)
}
  0x3f   : > { %s3369_s27 = scalar_lea.vmem %s215_s17, 4096  ;;  %p3377_p6 = scmp.lt.s32.totalorder %s215_s17, %s215_s17 }
  0x40   : > { %p3370_p2 = scmp.ne.s32.totalorder %s215_s17, %s3369_s27  ;;  %p3378_p7 = scmp.lt.s32.totalorder %s3369_s27, %s3369_s27 }
  0x42   : > { %p3372_p3 = pnand %p3370_p2, %p3625_p1  ;;  %p3379_p9 = por %p3378_p7, %p3377_p6 }
  0x44   : > { %p3373_p5 = pneg %p3372_p3 }
  0x46   : > { %p3380_p12 = pnand %p3379_p9, %p3373_p5 }
  0x48   : > { %3383 = shalt.err (!%p3380_p12)
}
  0x49   : > { %s3504_s25 = smov 64   ;;  %s3505_s29 = smov 4  }
  0x4a   : > { %3114 = dma.hbm_to_vmem [thread:$0]  (!%p3613_p13), %s3961_s1, 4096, %s215_s17, [#allocation4], %s3504_s25, %s3504_s25, %s3505_s29  }
  0x4b   : > { %s3506_s18 = smov [#allocation8]   ;;  %s3384_s8 = scalar_lea.hbm %s3963_s3, 2048 }
  0x4c   : > { %s240_s19 = sshll.u32 %s3506_s18, 4  ;;  %p3385_p4 = scmp.ne.s32.totalorder %s3963_s3, %s3384_s8  ;;  %s241_s19 = int_to_ptr.vmem [resolvable:$true] %s240_s19 }
  0x4d   : > { %p3391_p11 = scmp.lt.u32.totalorder %s3384_s8, %s3963_s3 }
  0x4e   : > { %p3387_p8 = pnand %p3385_p4, %p3625_p1 }
  0x50   : > { %p3388_p10 = pneg %p3387_p8 }
  0x52   : > { %p3393_p0 = pnand %p3391_p11, %p3388_p10 }
  0x54   : > { %3396 = shalt.err (!%p3393_p0)
}
  0x55   : > { %s3397_s17 = scalar_lea.vmem %s241_s19, 2048  ;;  %p3405_p6 = scmp.lt.s32.totalorder %s241_s19, %s241_s19 }
  0x56   : > { %p3398_p2 = scmp.ne.s32.totalorder %s241_s19, %s3397_s17  ;;  %p3406_p7 = scmp.lt.s32.totalorder %s3397_s17, %s3397_s17 }
  0x58   : > { %p3400_p3 = pnand %p3398_p2, %p3625_p1  ;;  %p3407_p9 = por %p3406_p7, %p3405_p6 }
  0x5a   : > { %p3401_p5 = pneg %p3400_p3 }
  0x5c   : > { %p3408_p12 = pnand %p3407_p9, %p3401_p5 }
  0x5e   : > { %3411 = shalt.err (!%p3408_p12)
}
  0x5f   : > { %3120 = dma.hbm_to_vmem [thread:$0]  (!%p3613_p13), %s3963_s3, 2048, %s241_s19, [#allocation7], %s3504_s25, %s3504_s25, %s3505_s29  }
  0x60   : > { %p3984_p4 = scmp.ne.s32.totalorder %s3979_s11, 0 }
  0x61   : > { %p3985_p8 = scmp.ne.s32.totalorder (!%p3984_p4), %s3980_s12, 0 }
  0x62   : > { %283 = sbr.rel (%p3984_p4) target bundleno = 942 (0x3ae), region = 44 }
  0x69   : > { %3465 = dma.done.wait (%p3985_p8), [#allocation4], 4096  }
  0x6a   : > { %3467 = vsyncadd (%p3985_p8), [#allocation4], 4294963200 }
  0x6b   : > { %3469 = dma.done.wait (%p3985_p8), [#allocation7], 4096  }
  0x6c   : > { %3471 = vsyncadd (%p3985_p8), [#allocation7], 4294963200  ;;  %v3507_v0 = vmov 0   ;;  %v3192_v1 = vld [vmem:[#allocation3 + $0x40] sm:$0xff]   ;;  %v3196_v5 = vld [vmem:[#allocation3 + $0x48] sm:$0xff]   ;;  %s2526_s2 = sshll.u32 %s3490_s24, 3 }
  0x6d   : > { %3190 = vset.pattern.permute.xlu0 %v3507_v0  ;;  %3191 = vset.pattern.permute.xlu1 %v3507_v0  ;;  %v3193_v2 = vld [vmem:[#allocation3 + $0xc0] sm:$0xff]   ;;  %v3197_v6 = vld [vmem:[#allocation3 + $0xc8] sm:$0xff]   ;;  %v3200_v9 = vld [vmem:[#allocation3 + $0x50] sm:$0xff]   ;;  %s2529_s11 = sshll.u32 %s3490_s24, 5  ;;  %p333_p13 = scmp.lt.s32.totalorder %s2526_s2, 15 }
  0x6e   : > { %2761 = vmatprep.subr.bf16.mxu0 %v3192_v1  ;;  %v3194_v3 = vld [vmem:[#allocation3] sm:$0xff]   ;;  %2873 = vmatprep.subr.bf16.mxu1 %v3193_v2  ;;  %v3198_v7 = vld [vmem:[#allocation3 + $0x8] sm:$0xff]   ;;  %v3201_v10 = vld [vmem:[#allocation3 + $0xd0] sm:$0xff]   ;;  %p344_p1 = scmp.lt.s32.totalorder %s2529_s11, 63  ;;  %s328_s13 = sand.u32 1, %s3482_s22  }
  0x6f   : > { %v3195_v4 = vld [vmem:[#allocation3 + $0x80] sm:$0xff]   ;;  %2762 = vmatpush3.bf16.msra.mxu0 %v3194_v3  ;;  %v3199_v8 = vld [vmem:[#allocation3 + $0x88] sm:$0xff]   ;;  %v3202_v11 = vld [vmem:[#allocation3 + $0x10] sm:$0xff]   ;;  %s3997_s2 = smov (!%p333_p13, %s2526_s2), 15  ;;  %s2525_s16 = sshll.u32 %s328_s13, 7 }
  0x70   : > { %2874 = vmatpush3.bf16.msra.mxu1 %v3195_v4  ;;  %2763 = vmatprep.subr.bf16.mxu0 %v3196_v5  ;;  %v3203_v12 = vld [vmem:[#allocation3 + $0x90] sm:$0xff]   ;;  %v3204_v13 = vld [vmem:[#allocation3 + $0x58] sm:$0xff]   ;;  %v3208_v17 = vld [vmem:[#allocation3 + $0x60] sm:$0xff]   ;;  %s3999_s11 = smov (!%p344_p1, %s2529_s11), 63  ;;  %s2632_s12 = sshll.u32 %s3997_s2, 5 }
  0x71   : > { %2875 = vmatprep.subr.bf16.mxu1 %v3197_v6  ;;  %v3205_v14 = vld [vmem:[#allocation3 + $0xd8] sm:$0xff]   ;;  %v3209_v18 = vld [vmem:[#allocation3 + $0xe0] sm:$0xff]   ;;  %v3212_v21 = vld [vmem:[#allocation3 + $0x68] sm:$0xff]   ;;  %s2530_s15 = sshll.u32 %s3999_s11, 3  ;;  %s3694_s29 = scalar_lea.vmem %s3960_s0, %s2632_s12 }
  0x72   : > { %v3206_v15 = vld [vmem:[#allocation3 + $0x18] sm:$0xff]   ;;  %v3210_v19 = vld [vmem:[#allocation3 + $0x20] sm:$0xff]   ;;  %v3213_v22 = vld [vmem:[#allocation3 + $0xe8] sm:$0xff]   ;;  %s3699_s20 = scalar_lea.vmem %s3965_s5, %s2530_s15  ;;  %s3885_s27 = scalar_lea.vmem [#allocation9], %s2525_s16 }
  0x73   : > { %2764 = vmatpush3.bf16.msra.mxu0 %v3198_v7  ;;  %v3207_v16 = vld [vmem:[#allocation3 + $0x98] sm:$0xff]   ;;  %v3211_v20 = vld [vmem:[#allocation3 + $0xa0] sm:$0xff]   ;;  %v3214_v23 = vld [vmem:[#allocation3 + $0x28] sm:$0xff]   ;;  %s2665_s17 = sshll.u32 %s3490_s24, 11  ;;  %s2393_s10 = sshll.u32 %s3885_s27, 4  ;;  %s3909_s10 = int_to_ptr.vmem [resolvable:$true] %s2393_s10 }
  0x74   : > { %2876 = vmatpush3.bf16.msra.mxu1 %v3199_v8  ;;  %2765 = vmatprep.subr.bf16.mxu0 %v3200_v9  ;;  %v3215_v24 = vld [vmem:[#allocation3 + $0xa8] sm:$0xff]   ;;  %v3216_v25 = vld [vmem:[#allocation3 + $0x70] sm:$0xff]   ;;  %v3220_v29 = vld [vmem:[#allocation3 + $0x78] sm:$0xff]   ;;  %s3907_s11 = scalar_lea.hbm %s3966_s6, %s2665_s17  ;;  %s3914_s12 = scalar_lea.sflag [#allocation5], %s328_s13 }
  0x75   : > { %2877 = vmatprep.subr.bf16.mxu1 %v3201_v10  ;;  %v3217_v26 = vld [vmem:[#allocation3 + $0xf0] sm:$0xff]   ;;  %v3221_v30 = vld [vmem:[#allocation3 + $0xf8] sm:$0xff]   ;;  %v388_v33 = vld [vmem:[%s3694_s29 + $0x8] sm:$0xff]  ;;  %s3412_s15 = scalar_lea.vmem %s3909_s10, 2048  ;;  %p3986_p11 = scmp.ne.s32.totalorder %s3976_s7, 0 }
  0x76   : > { %v3218_v27 = vld [vmem:[#allocation3 + $0x30] sm:$0xff]   ;;  %v3222_v31 = vld [vmem:[#allocation3 + $0x38] sm:$0xff]   ;;  %v387_v35 = vld [vmem:[%s3694_s29] sm:$0xff]  ;;  %v420_v36 = vunpack.c.l.s8.bf16 %v388_v33  ;;  %v424_v37 = vunpack.c.h.s8.bf16 %v388_v33  ;;  %p3413_p10 = scmp.ne.s32.totalorder %s3909_s10, %s3412_s15  ;;  %s3508_s24 = smov [#allocation9]  }
  0x77   : > { %2766 = vmatpush3.bf16.msra.mxu0 %v3202_v11  ;;  %v3219_v28 = vld [vmem:[#allocation3 + $0xb0] sm:$0xff]   ;;  %v3223_v32 = vld [vmem:[#allocation3 + $0xb8] sm:$0xff]   ;;  %v419_v41 = vunpack.c.l.s8.bf16 %v387_v35  ;;  %v1165_v43 = vld [vmem:[%s3699_s20] sm:$0xff]  ;;  %v423_v53 = vunpack.c.h.s8.bf16 %v387_v35  ;;  %s3416_s30 = sshll.u32 %s3508_s24, 4  ;;  %s3417_s30 = int_to_ptr.vmem [resolvable:$false] %s3416_s30 }
  0x78   : > { %2878 = vmatpush3.bf16.msra.mxu1 %v3203_v12  ;;  %2767 = vmatprep.subr.bf16.mxu0 %v3204_v13  ;;  %v390_v34 = vld [vmem:[%s3694_s29 + $0x18] sm:$0xff]  ;;  %v389_v40 = vld [vmem:[%s3694_s29 + $0x10] sm:$0xff]  ;;  %v1166_v44 = vld [vmem:[%s3699_s20 + $0x8] sm:$0xff]  ;;  %v1197_v46 = vmax.f32 %v1165_v43, 1.0  ;;  %p3414_p0 = pnand %p3413_p10, %p3986_p11  ;;  %s3418_s25 = scalar_lea.vmem %s3417_s30, 4096 }
  0x79   : > { %2879 = vmatprep.subr.bf16.mxu1 %v3205_v14  ;;  %v422_v38 = vunpack.c.l.s8.bf16 %v390_v34  ;;  %v426_v39 = vunpack.c.h.s8.bf16 %v390_v34  ;;  %v421_v42 = vunpack.c.l.s8.bf16 %v389_v40  ;;  %808 = vmatprep.mubr.bf16.mxu0 %v420_v36  ;;  %v1167_v45 = vld [vmem:[%s3699_s20 + $0x10] sm:$0xff]  ;;  %v1198_v47 = vmax.f32 %v1166_v44, 1.0  ;;  %v1169_v48 = vld [vmem:[%s3699_s20 + $0x20] sm:$0xff]  ;;  %v392_v49 = vld [vmem:[%s3694_s29 + $0x28] sm:$0xff]  ;;  %p3419_p3 = scmp.lt.s32.totalorder %s3909_s10, %s3417_s30  ;;  %p3420_p5 = scmp.lt.s32.totalorder %s3418_s25, %s3412_s15 }
  0x7a   : > { %v394_v50 = vld [vmem:[%s3694_s29 + $0x38] sm:$0xff]  ;;  %v1199_v51 = vmax.f32 %v1167_v45, 1.0  ;;  %3264 = vrcp.f32 %v1197_v46  ;;  %v425_v54 = vunpack.c.h.s8.bf16 %v389_v40  ;;  %v1201_v55 = vmax.f32 %v1169_v48, 1.0  ;;  %v1171_v59 = vld [vmem:[%s3699_s20 + $0x30] sm:$0xff]  ;;  %v1170_v60 = vld [vmem:[%s3699_s20 + $0x28] sm:$0xff]  ;;  %p3415_p2 = pneg %p3414_p0 }
  0x7b   : > { %2768 = vmatpush3.bf16.msra.mxu0 %v3206_v15  ;;  %969 = vmatprep.mubr.bf16.mxu1 %v422_v38  ;;  %v1168_v52 = vld [vmem:[%s3699_s20 + $0x18] sm:$0xff]  ;;  %3266 = vrcp.f32 %v1198_v47  ;;  %v428_v56 = vunpack.c.l.s8.bf16 %v392_v49  ;;  %v430_v57 = vunpack.c.l.s8.bf16 %v394_v50  ;;  %v1203_v61 = vmax.f32 %v1171_v59, 1.0  ;;  %v391_v62 = vld [vmem:[%s3694_s29 + $0x20] sm:$0xff]  ;;  %v393_v63 = vld [vmem:[%s3694_s29 + $0x30] sm:$0xff]  ;;  %p3421_p6 = por %p3420_p5, %p3419_p3 }
  0x7c   : > { %2880 = vmatpush3.bf16.msra.mxu1 %v3207_v16  ;;  %2769 = vmatprep.subr.bf16.mxu0 %v3208_v17  ;;  %3268 = vrcp.f32 %v1199_v51  ;;  %v1200_v58 = vmax.f32 %v1168_v52, 1.0  ;;  %v1202_v1 = vmax.f32 %v1170_v60, 1.0  ;;  %v1173_v2 = vld [vmem:[%s3699_s20 + $0x40] sm:$0xff]  ;;  %v1172_v3 = vld [vmem:[%s3699_s20 + $0x38] sm:$0xff]  ;;  %v427_v4 = vunpack.c.l.s8.bf16 %v391_v62  ;;  %v1175_v11 = vld [vmem:[%s3699_s20 + $0x50] sm:$0xff] }
  0x7d   : > { %2881 = vmatprep.subr.bf16.mxu1 %v3209_v18  ;;  %3270 = vrcp.f32 %v1201_v55  ;;  %v429_v5 = vunpack.c.l.s8.bf16 %v393_v63  ;;  %v1205_v6 = vmax.f32 %v1173_v2, 1.0  ;;  %v432_v8 = vunpack.c.h.s8.bf16 %v392_v49  ;;  %v1174_v13 = vld [vmem:[%s3699_s20 + $0x48] sm:$0xff]  ;;  %v1181_v34 = vld [vmem:[%s3699_s20 + $0x80] sm:$0xff]  ;;  %v1180_v35 = vld [vmem:[%s3699_s20 + $0x78] sm:$0xff]  ;;  %p3422_p7 = pnand %p3421_p6, %p3415_p2 }
  0x7e   : > { %3272 = vrcp.f32 %v1200_v58  ;;  %v434_v9 = vunpack.c.h.s8.bf16 %v394_v50  ;;  %v1204_v10 = vmax.f32 %v1172_v3, 1.0  ;;  %v3226_v15 = vld [vmem:[#allocation6 + $0x4] ss:$8 sps:$4 sm:$0xff]   ;;  %v1207_v17 = vmax.f32 %v1175_v11, 1.0  ;;  %v3224_v18 = vld [vmem:[#allocation6] ss:$8 sps:$4 sm:$0xff]  }
  0x7f   : > { %2770 = vmatpush3.bf16.msra.mxu0 %v3210_v19  ;;  %3274 = vrcp.f32 %v1203_v61  ;;  %v3721_v16 = vld [vmem:[%s3694_s29 + $0x48] sm:$0xff]  ;;  %v1206_v19 = vmax.f32 %v1174_v13, 1.0  ;;  %v3735_v36 = vld [vmem:[%s3699_s20 + $0x90] sm:$0xff]  ;;  %v3741_v40 = vld [vmem:[%s3694_s29 + $0x40] sm:$0xff]  ;;  %v1213_v46 = vmax.f32 %v1181_v34, 1.0  ;;  %v1212_v47 = vmax.f32 %v1180_v35, 1.0 }
  0x80   : > { %2882 = vmatpush3.bf16.msra.mxu1 %v3211_v20  ;;  %2771 = vmatprep.subr.bf16.mxu0 %v3212_v21  ;;  %3276 = vrcp.f32 %v1202_v1  ;;  %v1177_v20 = vld [vmem:[%s3699_s20 + $0x60] sm:$0xff]  ;;  %v3738_v38 = vld [vmem:[%s3699_s20 + $0x88] sm:$0xff]  ;;  %v1215_v50 = vmax.f32 %v3735_v36, 1.0  ;;  %v3235_v59 = vld [vmem:[#allocation6 + $0x34] ss:$8 sps:$4 sm:$0xff]  }
  0x81   : > { %2883 = vmatprep.subr.bf16.mxu1 %v3213_v22  ;;  %3278 = vrcp.f32 %v1205_v6  ;;  %v3725_v22 = vld [vmem:[%s3694_s29 + $0x58] sm:$0xff]  ;;  %v3232_v44 = vld [vmem:[#allocation6 + $0x24] ss:$8 sps:$4 sm:$0xff]   ;;  %v3230_v48 = vld [vmem:[#allocation6 + $0x20] ss:$8 sps:$4 sm:$0xff]   ;;  %v1214_v51 = vmax.f32 %v3738_v38, 1.0 }
  0x82   : > { %3280 = vrcp.f32 %v1204_v10  ;;  %v1185_v55 = vld [vmem:[%s3699_s20 + $0xa0] sm:$0xff]  ;;  %v442_v58 = vunpack.c.h.s8.bf16 %v3725_v22  ;;  %v3233_v61 = vld [vmem:[#allocation6 + $0x30] ss:$8 sps:$4 sm:$0xff]   ;;  %v1186_v13 = vld [vmem:[%s3699_s20 + $0xa8] sm:$0xff] }
  0x83   : > { %2772 = vmatpush3.bf16.msra.mxu0 %v3214_v23  ;;  %v1176_v23 = vld [vmem:[%s3699_s20 + $0x58] sm:$0xff]  ;;  %3282 = vrcp.f32 %v1207_v17  ;;  %v1217_v2 = vmax.f32 %v1185_v55, 1.0  ;;  %v1190_v34 = vld [vmem:[%s3699_s20 + $0xc8] sm:$0xff]  ;;  %v1193_v38 = vld [vmem:[%s3699_s20 + $0xe0] sm:$0xff] }
  0x84   : > { %2884 = vmatpush3.bf16.msra.mxu1 %v3215_v24  ;;  %2773 = vmatprep.subr.bf16.mxu0 %v3216_v25  ;;  %v3265_v7 = vpop.eup %3264  ;;  %v3229_v24 = vld [vmem:[#allocation6 + $0x14] ss:$8 sps:$4 sm:$0xff]   ;;  %3284 = vrcp.f32 %v1206_v19  ;;  %v1208_v33 = vmax.f32 %v1176_v23, 1.0 }
  0x85   : > { %2885 = vmatprep.subr.bf16.mxu1 %v3217_v26  ;;  %v3267_v12 = vpop.eup %3266  ;;  %1327 = vperm.xlu0 %3190, %v3265_v7   ;;  %v1179_v26 = vld [vmem:[%s3699_s20 + $0x70] sm:$0xff]  ;;  %v3758_v1 = vld [vmem:[%s3694_s29 + $0x78] sm:$0xff] }
  0x86   : > { %v3269_v14 = vpop.eup %3268  ;;  %v1211_v43 = vmax.f32 %v1179_v26, 1.0  ;;  %v1187_v7 = vld [vmem:[%s3699_s20 + $0xb0] sm:$0xff]  ;;  %v446_v11 = vunpack.c.l.s8.bf16 %v3758_v1  ;;  %v1188_v23 = vld [vmem:[%s3699_s20 + $0xb8] sm:$0xff] }
  0x87   : > { %2774 = vmatpush3.bf16.msra.mxu0 %v3218_v27  ;;  %v3271_v21 = vpop.eup %3270  ;;  %1337 = vperm.xlu1 %3191, %v3269_v14   ;;  %v431_v27 = vunpack.c.h.s8.bf16 %v391_v62  ;;  %v3241_v17 = vld [vmem:[#allocation6 + $0x54] ss:$8 sps:$4 sm:$0xff]  }
  0x88   : > { %2886 = vmatpush3.bf16.msra.mxu1 %v3219_v28  ;;  %2775 = vmatprep.subr.bf16.mxu0 %v3220_v29  ;;  %v3273_v25 = vpop.eup %3272  ;;  %v433_v28 = vunpack.c.h.s8.bf16 %v393_v63  ;;  %v1209_v29 = vmax.f32 %v1177_v20, 1.0  ;;  %v3755_v63 = vld [vmem:[%s3694_s29 + $0x68] sm:$0xff]  ;;  %v401_v19 = vld [vmem:[%s3694_s29 + $0x70] sm:$0xff]  ;;  %v1218_v20 = vmax.f32 %v1186_v13, 1.0 }
  0x89   : > { %2887 = vmatprep.subr.bf16.mxu1 %v3221_v30  ;;  %1332 = vperm.xlu0 %3190, %v3267_v12   ;;  %v1178_v30 = vld [vmem:[%s3699_s20 + $0x68] sm:$0xff]  ;;  %v444_v10 = vunpack.c.l.s8.bf16 %v3755_v63 }
  0x8a   : > { %3286 = vrcp.f32 %v1209_v29  ;;  %v1210_v45 = vmax.f32 %v1178_v30, 1.0  ;;  %v448_v29 = vunpack.c.h.s8.bf16 %v3755_v63  ;;  %v450_v30 = vunpack.c.h.s8.bf16 %v3758_v1 }
  0x8b   : > { %2776 = vmatpush3.bf16.msra.mxu0 %v3222_v31  ;;  %v436_v31 = vunpack.c.l.s8.bf16 %v3721_v16  ;;  %1342 = vperm.xlu1 %3191, %v3273_v25   ;;  %3288 = vrcp.f32 %v1208_v33  ;;  %v3239_v25 = vld [vmem:[#allocation6 + $0x50] ss:$8 sps:$4 sm:$0xff]  }
  0x8c   : > { %2888 = vmatpush3.bf16.msra.mxu1 %v3223_v32  ;;  %1641 = vmatprep.subr.bf16.mxu0 %v3226_v15  ;;  %v438_v32 = vunpack.c.l.s8.bf16 %v3725_v22  ;;  %3290 = vrcp.f32 %v1211_v43  ;;  %v3236_v15 = vld [vmem:[#allocation6 + $0x40] ss:$8 sps:$4 sm:$0xff]   ;;  %v406_v43 = vld [vmem:[%s3694_s29 + $0x98] sm:$0xff] }
  0x8d   : > { %1347 = vperm.xlu0 %3190, %v3271_v21   ;;  %3292 = vrcp.f32 %v1210_v45  ;;  %v1189_v21 = vld [vmem:[%s3699_s20 + $0xc0] sm:$0xff] }
  0x8e   : > { %809 = vmatmul.mubr.bf16.vlgmr.msra.gmra.mrb[0].mxu0 %v419_v41  ;;  %v3227_v41 = vld [vmem:[#allocation6 + $0x10] ss:$8 sps:$4 sm:$0xff]   ;;  %3294 = vrcp.f32 %v1213_v46 }
  0x8f   : > { %970 = vmatmul.mubr.bf16.vlgmr.msra.gmra.mrb[0].mxu1 %v421_v42  ;;  %816 = vmatprep.mubr.bf16.mxu0 %v424_v37  ;;  %v3275_v37 = vpop.eup %3274  ;;  %v3744_v42 = vld [vmem:[%s3694_s29 + $0x50] sm:$0xff]  ;;  %3296 = vrcp.f32 %v1212_v47  ;;  %v449_v47 = vunpack.c.h.s8.bf16 %v401_v19 }
  0x90   : > { %977 = vmatprep.mubr.bf16.mxu1 %v426_v39  ;;  %1642 = vmatpush1.bf16.msra.mxu0 %v3224_v18  ;;  %v3277_v39 = vpop.eup %3276  ;;  %3298 = vrcp.f32 %v1215_v50  ;;  %v399_v18 = vld [vmem:[%s3694_s29 + $0x60] sm:$0xff]  ;;  %v454_v50 = vunpack.c.l.s8.bf16 %v406_v43 }
  0x91   : > { %1643 = vmatprep.subr.bf16.mxu0 %v3229_v24  ;;  %v3279_v49 = vpop.eup %3278  ;;  %1357 = vperm.xlu0 %3190, %v3275_v37   ;;  %3300 = vrcp.f32 %v1214_v51  ;;  %v443_v26 = vunpack.c.l.s8.bf16 %v399_v18  ;;  %v1222_v37 = vmax.f32 %v1190_v34, 1.0  ;;  %v447_v46 = vunpack.c.h.s8.bf16 %v399_v18 }
  0x92   : > { %1352 = vperm.xlu1 %3191, %v3277_v39   ;;  %v3281_v52 = vpop.eup %3280  ;;  %3302 = vrcp.f32 %v1217_v2  ;;  %v3242_v39 = vld [vmem:[#allocation6 + $0x60] ss:$8 sps:$4 sm:$0xff]  }
  0x93   : > { %v3283_v60 = vpop.eup %3282 }
  0x94   : > { %1644 = vmatpush1.bf16.msra.mxu0 %v3227_v41  ;;  %v3285_v62 = vpop.eup %3284 }
  0x95   : > { %1645 = vmatprep.subr.bf16.mxu0 %v3232_v44  ;;  %1367 = vperm.xlu0 %3190, %v3279_v49   ;;  %v1192_v44 = vld [vmem:[%s3699_s20 + $0xd8] sm:$0xff] }
  0x96   : > { %817 = vmatmul.mubr.bf16.gmra.mrb[4].mxu0 %v423_v53  ;;  %v435_v53 = vunpack.c.l.s8.bf16 %v3741_v40  ;;  %1362 = vperm.xlu1 %3191, %v3281_v52   ;;  %v1224_v51 = vmax.f32 %v1192_v44, 1.0  ;;  %v1195_v52 = vld [vmem:[%s3699_s20 + $0xf0] sm:$0xff]  ;;  %v415_v44 = vld [vmem:[%s3694_s29 + $0xe0] sm:$0xff] }
  0x97   : > { %978 = vmatmul.mubr.bf16.gmra.mrb[4].mxu1 %v425_v54  ;;  %824 = vmatprep.mubr.bf16.mxu0 %v428_v56  ;;  %v437_v54 = vunpack.c.l.s8.bf16 %v3744_v42  ;;  %v1184_v56 = vld [vmem:[%s3699_s20 + $0x98] sm:$0xff] }
  0x98   : > { %985 = vmatprep.mubr.bf16.mxu1 %v430_v57  ;;  %v440_v57 = vunpack.c.h.s8.bf16 %v3721_v16  ;;  %1646 = vmatpush1.bf16.msra.mxu0 %v3230_v48  ;;  %v1216_v3 = vmax.f32 %v1184_v56, 1.0  ;;  %v1219_v16 = vmax.f32 %v1187_v7, 1.0  ;;  %v1225_v48 = vmax.f32 %v1193_v38, 1.0  ;;  %v3245_v7 = vld [vmem:[#allocation6 + $0x70] ss:$8 sps:$4 sm:$0xff]   ;;  %v416_v38 = vld [vmem:[%s3694_s29 + $0xe8] sm:$0xff] }
  0x99   : > { %1377 = vperm.xlu0 %3190, %v3283_v60   ;;  %1647 = vmatprep.subr.bf16.mxu0 %v3235_v59  ;;  %v1227_v56 = vmax.f32 %v1195_v52, 1.0  ;;  %v3248_v52 = vld [vmem:[#allocation8 + $0x40] sm:$0xff]  }
  0x9a   : > { %1372 = vperm.xlu1 %3191, %v3285_v62   ;;  %3304 = vrcp.f32 %v1216_v3  ;;  %v458_v3 = vunpack.c.h.s8.bf16 %v406_v43  ;;  %2985 = vmatprep.subr.bf16.mxu1 %v3248_v52 }
  0x9b   : > { %3306 = vrcp.f32 %v1219_v16 }
  0x9c   : > { %1648 = vmatpush1.bf16.msra.mxu0 %v3233_v61  ;;  %3308 = vrcp.f32 %v1218_v20  ;;  %v1196_v61 = vld [vmem:[%s3699_s20 + $0xf8] sm:$0xff]  ;;  %v409_v20 = vld [vmem:[%s3694_s29 + $0xb0] sm:$0xff] }
  0x9e   : > { %825 = vmatmul.mubr.bf16.gmra.mrb[8].mxu0 %v427_v4  ;;  %v3238_v4 = vld [vmem:[#allocation6 + $0x44] ss:$8 sps:$4 sm:$0xff]  }
  0x9f   : > { %986 = vmatmul.mubr.bf16.gmra.mrb[8].mxu1 %v429_v5  ;;  %832 = vmatprep.mubr.bf16.mxu0 %v432_v8  ;;  %v3287_v5 = vpop.eup %3286  ;;  %v439_v8 = vunpack.c.h.s8.bf16 %v3741_v40  ;;  %v3244_v40 = vld [vmem:[#allocation6 + $0x64] ss:$8 sps:$4 sm:$0xff]  }
  0xa0   : > { %993 = vmatprep.mubr.bf16.mxu1 %v434_v9  ;;  %v3289_v6 = vpop.eup %3288  ;;  %v441_v9 = vunpack.c.h.s8.bf16 %v3744_v42  ;;  %1649 = vmatprep.subr.bf16.mxu0 %v3238_v4  ;;  %v404_v42 = vld [vmem:[%s3694_s29 + $0x88] sm:$0xff]  ;;  %v1228_v4 = vmax.f32 %v1196_v61, 1.0 }
  0xa1   : > { %v3291_v12 = vpop.eup %3290  ;;  %1387 = vperm.xlu0 %3190, %v3287_v5   ;;  %1382 = vperm.xlu1 %3191, %v3289_v6   ;;  %v452_v49 = vunpack.c.l.s8.bf16 %v404_v42  ;;  %v456_v2 = vunpack.c.h.s8.bf16 %v404_v42  ;;  %v476_v42 = vunpack.c.l.s8.bf16 %v416_v38 }
  0xa2   : > { %v3293_v14 = vpop.eup %3292  ;;  %1650 = vmatpush1.bf16.msra.mxu0 %v3236_v15 }
  0xa3   : > { %v3295_v22 = vpop.eup %3294  ;;  %1651 = vmatprep.subr.bf16.mxu0 %v3241_v17 }
  0xa4   : > { %v3297_v24 = vpop.eup %3296 }
  0xa5   : > { %1397 = vperm.xlu0 %3190, %v3291_v12   ;;  %1392 = vperm.xlu1 %3191, %v3293_v14   ;;  %v3299_v33 = vpop.eup %3298 }
  0xa6   : > { %833 = vmatmul.mubr.bf16.gmra.mrb[12].mxu0 %v431_v27  ;;  %v445_v27 = vunpack.c.l.s8.bf16 %v401_v19  ;;  %v3301_v35 = vpop.eup %3300  ;;  %v407_v19 = vld [vmem:[%s3694_s29 + $0xa0] sm:$0xff] }
  0xa7   : > { %994 = vmatmul.mubr.bf16.gmra.mrb[12].mxu1 %v433_v28  ;;  %840 = vmatprep.mubr.bf16.mxu0 %v436_v31  ;;  %v1221_v28 = vmax.f32 %v1189_v21, 1.0  ;;  %v1220_v31 = vmax.f32 %v1188_v23, 1.0  ;;  %v3303_v41 = vpop.eup %3302  ;;  %v461_v23 = vunpack.c.l.s8.bf16 %v409_v20 }
  0xa8   : > { %1001 = vmatprep.mubr.bf16.mxu1 %v438_v32  ;;  %v1191_v32 = vld [vmem:[%s3699_s20 + $0xd0] sm:$0xff]  ;;  %1652 = vmatpush1.bf16.msra.mxu0 %v3239_v25  ;;  %v3305_v45 = vpop.eup %3304 }
  0xa9   : > { %1407 = vperm.xlu0 %3190, %v3295_v22   ;;  %1402 = vperm.xlu1 %3191, %v3297_v24   ;;  %3310 = vrcp.f32 %v1221_v28  ;;  %v1223_v36 = vmax.f32 %v1191_v32, 1.0  ;;  %v459_v22 = vunpack.c.l.s8.bf16 %v407_v19  ;;  %v463_v28 = vunpack.c.h.s8.bf16 %v407_v19  ;;  %v411_v32 = vld [vmem:[%s3694_s29 + $0xc0] sm:$0xff] }
  0xaa   : > { %3312 = vrcp.f32 %v1220_v31  ;;  %1653 = vmatprep.subr.bf16.mxu0 %v3244_v40  ;;  %v467_v34 = vunpack.c.l.s8.bf16 %v411_v32  ;;  %v471_v40 = vunpack.c.h.s8.bf16 %v411_v32  ;;  %v3258_v32 = vld [vmem:[#allocation8 + $0x68] sm:$0xff]  }
  0xab   : > { %3314 = vrcp.f32 %v1223_v36 }
  0xac   : > { %1654 = vmatpush1.bf16.msra.mxu0 %v3242_v39  ;;  %3316 = vrcp.f32 %v1222_v37  ;;  %v418_v39 = vld [vmem:[%s3694_s29 + $0xf8] sm:$0xff] }
  0xad   : > { %1417 = vperm.xlu0 %3190, %v3299_v33   ;;  %1412 = vperm.xlu1 %3191, %v3301_v35   ;;  %3318 = vrcp.f32 %v1225_v48  ;;  %v413_v33 = vld [vmem:[%s3694_s29 + $0xd0] sm:$0xff]  ;;  %v478_v43 = vunpack.c.l.s8.bf16 %v418_v39  ;;  %v480_v48 = vunpack.c.h.s8.bf16 %v416_v38 }
  0xae   : > { %841 = vmatmul.mubr.bf16.gmra.mrb[16].mxu0 %v435_v53  ;;  %v3307_v53 = vpop.eup %3306  ;;  %3320 = vrcp.f32 %v1224_v51  ;;  %v469_v35 = vunpack.c.l.s8.bf16 %v413_v33 }
  0xaf   : > { %1002 = vmatmul.mubr.bf16.gmra.mrb[16].mxu1 %v437_v54  ;;  %848 = vmatprep.mubr.bf16.mxu0 %v440_v57  ;;  %v1194_v54 = vld [vmem:[%s3699_s20 + $0xe8] sm:$0xff]  ;;  %v3309_v55 = vpop.eup %3308  ;;  %v403_v57 = vld [vmem:[%s3694_s29 + $0x80] sm:$0xff]  ;;  %3322 = vrcp.f32 %v1227_v56 }
  0xb0   : > { %1009 = vmatprep.mubr.bf16.mxu1 %v442_v58  ;;  %v405_v58 = vld [vmem:[%s3694_s29 + $0x90] sm:$0xff]  ;;  %v1226_v59 = vmax.f32 %v1194_v54, 1.0  ;;  %v451_v63 = vunpack.c.l.s8.bf16 %v403_v57  ;;  %v455_v13 = vunpack.c.h.s8.bf16 %v403_v57  ;;  %v3250_v54 = vld [vmem:[#allocation8 + $0x48] sm:$0xff]  }
  0xb1   : > { %1427 = vperm.xlu0 %3190, %v3303_v41   ;;  %1422 = vperm.xlu1 %3191, %v3305_v45   ;;  %v453_v1 = vunpack.c.l.s8.bf16 %v405_v58  ;;  %v457_v14 = vunpack.c.h.s8.bf16 %v405_v58  ;;  %v473_v41 = vunpack.c.h.s8.bf16 %v413_v33  ;;  %v417_v45 = vld [vmem:[%s3694_s29 + $0xf0] sm:$0xff] }
  0xb2   : > { %3324 = vrcp.f32 %v1226_v59  ;;  %v481_v51 = vunpack.c.h.s8.bf16 %v417_v45 }
  0xb3   : > { %v3311_v60 = vpop.eup %3310  ;;  %3326 = vrcp.f32 %v1228_v4 }
  0xb4   : > { %v3313_v62 = vpop.eup %3312 }
  0xb5   : > { %1437 = vperm.xlu0 %3190, %v3307_v53   ;;  %1432 = vperm.xlu1 %3191, %v3309_v55   ;;  %v3315_v5 = vpop.eup %3314  ;;  %v3249_v53 = vld [vmem:[#allocation8] sm:$0xff]   ;;  %v3251_v55 = vld [vmem:[#allocation8 + $0x8] sm:$0xff]  }
  0xb6   : > { %849 = vmatmul.mubr.bf16.gmra.mrb[20].mxu0 %v439_v8  ;;  %v3317_v6 = vpop.eup %3316  ;;  %v3247_v8 = vld [vmem:[#allocation6 + $0x74] ss:$8 sps:$4 sm:$0xff]   ;;  %2986 = vmatpush3.bf16.msra.mxu1 %v3249_v53 }
  0xb7   : > { %1010 = vmatmul.mubr.bf16.gmra.mrb[20].mxu1 %v441_v9  ;;  %856 = vmatprep.mubr.bf16.mxu0 %v444_v10  ;;  %v3319_v9 = vpop.eup %3318  ;;  %v408_v10 = vld [vmem:[%s3694_s29 + $0xa8] sm:$0xff] }
  0xb8   : > { %1017 = vmatprep.mubr.bf16.mxu1 %v446_v11  ;;  %v410_v11 = vld [vmem:[%s3694_s29 + $0xb8] sm:$0xff]  ;;  %v3321_v12 = vpop.eup %3320  ;;  %1655 = vmatprep.subr.bf16.mxu0 %v3247_v8  ;;  %v460_v15 = vunpack.c.l.s8.bf16 %v408_v10  ;;  %v464_v24 = vunpack.c.h.s8.bf16 %v408_v10  ;;  %v3253_v8 = vld [vmem:[#allocation8 + $0x10] sm:$0xff]  }
  0xb9   : > { %1447 = vperm.xlu0 %3190, %v3311_v60   ;;  %1442 = vperm.xlu1 %3191, %v3313_v62   ;;  %v462_v16 = vunpack.c.l.s8.bf16 %v410_v11  ;;  %v3323_v17 = vpop.eup %3322  ;;  %v466_v25 = vunpack.c.h.s8.bf16 %v410_v11 }
  0xba   : > { %1656 = vmatpush1.bf16.msra.mxu0 %v3245_v7  ;;  %2987 = vmatprep.subr.bf16.mxu1 %v3250_v54  ;;  %v3252_v7 = vld [vmem:[#allocation8 + $0x50] sm:$0xff]   ;;  %v3262_v54 = vld [vmem:[#allocation8 + $0x78] sm:$0xff]  }
  0xbb   : > { %2988 = vmatpush3.bf16.msra.mxu1 %v3251_v55 }
  0xbc   : > { %v3325_v18 = vpop.eup %3324  ;;  %2989 = vmatprep.subr.bf16.mxu1 %v3252_v7 }
  0xbd   : > { %1457 = vperm.xlu0 %3190, %v3315_v5   ;;  %1452 = vperm.xlu1 %3191, %v3317_v6   ;;  %v3327_v21 = vpop.eup %3326 }
  0xbe   : > { %857 = vmatmul.mubr.bf16.gmra.mrb[24].mxu0 %v443_v26  ;;  %v412_v26 = vld [vmem:[%s3694_s29 + $0xc8] sm:$0xff] }
  0xbf   : > { %1018 = vmatmul.mubr.bf16.gmra.mrb[24].mxu1 %v445_v27  ;;  %864 = vmatprep.mubr.bf16.mxu0 %v448_v29  ;;  %v414_v27 = vld [vmem:[%s3694_s29 + $0xd8] sm:$0xff]  ;;  %v465_v29 = vunpack.c.h.s8.bf16 %v409_v20  ;;  %v472_v36 = vunpack.c.h.s8.bf16 %v412_v26 }
  0xc0   : > { %1025 = vmatprep.mubr.bf16.mxu1 %v450_v30  ;;  %v468_v30 = vunpack.c.l.s8.bf16 %v412_v26  ;;  %v470_v31 = vunpack.c.l.s8.bf16 %v414_v27  ;;  %v474_v37 = vunpack.c.h.s8.bf16 %v414_v27  ;;  %2990 = vmatpush3.bf16.msra.mxu1 %v3253_v8 }
  0xc1   : > { %1467 = vperm.xlu0 %3190, %v3319_v9   ;;  %1462 = vperm.xlu1 %3191, %v3321_v12   ;;  %v3254_v9 = vld [vmem:[#allocation8 + $0x58] sm:$0xff]  }
  0xc2   : > { %2991 = vmatprep.subr.bf16.mxu1 %v3254_v9 }
  0xc5   : > { %1477 = vperm.xlu0 %3190, %v3323_v17   ;;  %1472 = vperm.xlu1 %3191, %v3325_v18   ;;  %v3256_v18 = vld [vmem:[#allocation8 + $0x60] sm:$0xff]  }
  0xc6   : > { %865 = vmatmul.mubr.bf16.gmra.mrb[28].mxu0 %v447_v46  ;;  %v475_v46 = vunpack.c.l.s8.bf16 %v415_v44 }
  0xc7   : > { %1026 = vmatmul.mubr.bf16.gmra.mrb[28].mxu1 %v449_v47  ;;  %872 = vmatprep.mubr.bf16.mxu0 %v452_v49  ;;  %v477_v47 = vunpack.c.l.s8.bf16 %v417_v45  ;;  %v482_v49 = vunpack.c.h.s8.bf16 %v418_v39 }
  0xc8   : > { %1033 = vmatprep.mubr.bf16.mxu1 %v454_v50  ;;  %v479_v50 = vunpack.c.h.s8.bf16 %v415_v44 }
  0xc9   : > { %1482 = vperm.xlu1 %3191, %v3327_v21  }
  0xce   : > { %873 = vmatmul.mubr.bf16.gmra.mrb[32].mxu0 %v451_v63 }
  0xcf   : > { %1034 = vmatmul.mubr.bf16.gmra.mrb[32].mxu1 %v453_v1  ;;  %880 = vmatprep.mubr.bf16.mxu0 %v456_v2 }
  0xd0   : > { %1041 = vmatprep.mubr.bf16.mxu1 %v458_v3 }
  0xd6   : > { %881 = vmatmul.mubr.bf16.gmra.mrb[36].mxu0 %v455_v13  ;;  %v3255_v13 = vld [vmem:[#allocation8 + $0x18] sm:$0xff]  }
  0xd7   : > { %1042 = vmatmul.mubr.bf16.gmra.mrb[36].mxu1 %v457_v14  ;;  %888 = vmatprep.mubr.bf16.mxu0 %v460_v15 }
  0xd8   : > { %1049 = vmatprep.mubr.bf16.mxu1 %v462_v16  ;;  %2992 = vmatpush3.bf16.msra.mxu1 %v3255_v13 }
  0xd9   : > { %2993 = vmatprep.subr.bf16.mxu1 %v3256_v18 }
  0xde   : > { %889 = vmatmul.mubr.bf16.gmra.mrb[40].mxu0 %v459_v22 }
  0xdf   : > { %1050 = vmatmul.mubr.bf16.gmra.mrb[40].mxu1 %v461_v23  ;;  %896 = vmatprep.mubr.bf16.mxu0 %v464_v24 }
  0xe0   : > { %1057 = vmatprep.mubr.bf16.mxu1 %v466_v25 }
  0xe6   : > { %897 = vmatmul.mubr.bf16.gmra.mrb[44].mxu0 %v463_v28  ;;  %v3257_v28 = vld [vmem:[#allocation8 + $0x20] sm:$0xff]  }
  0xe7   : > { %1058 = vmatmul.mubr.bf16.gmra.mrb[44].mxu1 %v465_v29  ;;  %904 = vmatprep.mubr.bf16.mxu0 %v468_v30 }
  0xe8   : > { %1065 = vmatprep.mubr.bf16.mxu1 %v470_v31  ;;  %2994 = vmatpush3.bf16.msra.mxu1 %v3257_v28 }
  0xe9   : > { %2995 = vmatprep.subr.bf16.mxu1 %v3258_v32 }
  0xee   : > { %905 = vmatmul.mubr.bf16.gmra.mrb[48].mxu0 %v467_v34 }
  0xef   : > { %1066 = vmatmul.mubr.bf16.gmra.mrb[48].mxu1 %v469_v35  ;;  %912 = vmatprep.mubr.bf16.mxu0 %v472_v36  ;;  %v3259_v35 = vld [vmem:[#allocation8 + $0x28] sm:$0xff]  }
  0xf0   : > { %1073 = vmatprep.mubr.bf16.mxu1 %v474_v37  ;;  %2996 = vmatpush3.bf16.msra.mxu1 %v3259_v35 }
  0xf6   : > { %913 = vmatmul.mubr.bf16.gmra.mrb[52].mxu0 %v471_v40  ;;  %v3260_v40 = vld [vmem:[#allocation8 + $0x70] sm:$0xff]  }
  0xf7   : > { %1074 = vmatmul.mubr.bf16.gmra.mrb[52].mxu1 %v473_v41  ;;  %920 = vmatprep.mubr.bf16.mxu0 %v476_v42 }
  0xf8   : > { %1081 = vmatprep.mubr.bf16.mxu1 %v478_v43  ;;  %2997 = vmatprep.subr.bf16.mxu1 %v3260_v40 }
  0xfe   : > { %921 = vmatmul.mubr.bf16.gmra.mrb[56].mxu0 %v475_v46 }
  0xff   : > { %1082 = vmatmul.mubr.bf16.gmra.mrb[56].mxu1 %v477_v47  ;;  %928 = vmatprep.mubr.bf16.mxu0 %v480_v48 }
 0x100   : > { %1089 = vmatprep.mubr.bf16.mxu1 %v482_v49 }
 0x104   : > { %v1328_v56 = vpop.permute.xlu0 %1327 }
 0x106   : > { %929 = vmatmul.mubr.bf16.gmra.mrb[60].mxu0 %v479_v50  ;;  %v1338_v12 = vpop.permute.xlu1 %1337  ;;  %v3261_v50 = vld [vmem:[#allocation8 + $0x30] sm:$0xff]  }
 0x107   : > { %1090 = vmatmul.mubr.bf16.gmra.mrb[60].mxu1 %v481_v51  ;;  %1673 = vmatprep.mubr.bf16.mxu0 %v3507_v0 }
 0x108   : > { %v1333_v11 = vpop.permute.xlu0 %1332  ;;  %2998 = vmatpush3.bf16.msra.mxu1 %v3261_v50 }
 0x109   : > { %2999 = vmatprep.subr.bf16.mxu1 %v3262_v54 }
 0x10a   : > { %v1343_v34 = vpop.permute.xlu1 %1342 }
 0x161   : > { %v2777_v57 = vpop.f32.mrb[0].mxu0 }
 0x162   : > { %v2889_v58 = vpop.f32.mrb[0].mxu1  ;;  %v2778_v59 = vpop.f32.mrb[1].mxu0 }
 0x163   : > { %v2890_v60 = vpop.f32.mrb[1].mxu1  ;;  %v2779_v61 = vadd.f32 %v2778_v59, %v2777_v57  ;;  %v2780_v63 = vpop.f32.mrb[2].mxu0 }
 0x164   : > { %v2891_v62 = vadd.f32 %v2890_v60, %v2889_v58  ;;  %v2892_v1 = vpop.f32.mrb[2].mxu1  ;;  %v2781_v2 = vpop.f32.mrb[3].mxu0  ;;  %v3263_v58 = vld [vmem:[#allocation8 + $0x38] sm:$0xff]  }
 0x165   : > { %v2893_v3 = vpop.f32.mrb[3].mxu1  ;;  %v2782_v5 = vadd.f32 %v2781_v2, %v2780_v63  ;;  %v1353_v57 = vpop.permute.xlu1 %1352  ;;  %3000 = vmatpush3.bf16.msra.mxu1 %v3263_v58 }
 0x166   : > { %v972_v4 = vadd.f32 %v2891_v62, %v2779_v61  ;;  %v2894_v6 = vadd.f32 %v2893_v3, %v2892_v1 }
 0x168   : > { %v975_v10 = vadd.f32 %v2894_v6, %v2782_v5  ;;  %v1485_v14 = vmul.f32 %v1328_v56, %v972_v4  ;;  %v1348_v56 = vpop.permute.xlu0 %1347 }
 0x169   : > { %v2783_v16 = vpop.f32.mrb[4].mxu0 }
 0x16a   : > { %v1486_v15 = vmul.f32 %v1333_v11, %v975_v10  ;;  %v2895_v17 = vpop.f32.mrb[4].mxu1  ;;  %v2784_v19 = vpop.f32.mrb[5].mxu0 }
 0x16b   : > { %v2896_v20 = vpop.f32.mrb[5].mxu1  ;;  %v2785_v22 = vadd.f32 %v2784_v19, %v2783_v16  ;;  %v2786_v24 = vpop.f32.mrb[6].mxu0 }
 0x16c   : > { %v1517_v21 = vpack.c.bf16 %v1486_v15, %v1485_v14  ;;  %v2897_v23 = vadd.f32 %v2896_v20, %v2895_v17  ;;  %v2898_v25 = vpop.f32.mrb[6].mxu1  ;;  %v2787_v26 = vpop.f32.mrb[7].mxu0 }
 0x16d   : > { %v2899_v27 = vpop.f32.mrb[7].mxu1  ;;  %v2788_v30 = vadd.f32 %v2787_v26, %v2786_v24  ;;  %v1358_v13 = vpop.permute.xlu0 %1357 }
 0x16e   : > { %v980_v29 = vadd.f32 %v2897_v23, %v2785_v22  ;;  %v2900_v31 = vadd.f32 %v2899_v27, %v2898_v25  ;;  %1674 = vmatmul.mubr.bf16.vlgmr.msra.gmra.mrb[64].mxu0 %v1517_v21  ;;  %v1363_v14 = vpop.permute.xlu1 %1362 }
 0x16f   : > { %1683 = vmatprep.mubr.bf16.mxu0 %v3507_v0 }
 0x170   : > { %v983_v33 = vadd.f32 %v2900_v31, %v2788_v30  ;;  %v1487_v36 = vmul.f32 %v1338_v12, %v980_v29 }
 0x171   : > { %v2789_v38 = vpop.f32.mrb[8].mxu0  ;;  %v1368_v32 = vpop.permute.xlu0 %1367 }
 0x172   : > { %v1488_v37 = vmul.f32 %v1343_v34, %v983_v33  ;;  %v2901_v39 = vpop.f32.mrb[8].mxu1  ;;  %v2790_v41 = vpop.f32.mrb[9].mxu0 }
 0x173   : > { %v2902_v42 = vpop.f32.mrb[9].mxu1  ;;  %v2791_v43 = vadd.f32 %v2790_v41, %v2789_v38  ;;  %v2792_v45 = vpop.f32.mrb[10].mxu0 }
 0x174   : > { %v2903_v44 = vadd.f32 %v2902_v42, %v2901_v39  ;;  %v2904_v46 = vpop.f32.mrb[10].mxu1  ;;  %v1518_v47 = vpack.c.bf16 %v1488_v37, %v1487_v36  ;;  %v2793_v48 = vpop.f32.mrb[11].mxu0 }
 0x175   : > { %v2905_v49 = vpop.f32.mrb[11].mxu1  ;;  %v2794_v52 = vadd.f32 %v2793_v48, %v2792_v45  ;;  %v1373_v33 = vpop.permute.xlu1 %1372 }
 0x176   : > { %v988_v51 = vadd.f32 %v2903_v44, %v2791_v43  ;;  %v2906_v53 = vadd.f32 %v2905_v49, %v2904_v46  ;;  %1684 = vmatmul.mubr.bf16.gmra.mrb[68].mxu0 %v1518_v47 }
 0x177   : > { %1693 = vmatprep.mubr.bf16.mxu0 %v3507_v0 }
 0x178   : > { %v991_v55 = vadd.f32 %v2906_v53, %v2794_v52  ;;  %v1489_v59 = vmul.f32 %v1348_v56, %v988_v51  ;;  %v1378_v51 = vpop.permute.xlu0 %1377 }
 0x179   : > { %v2795_v61 = vpop.f32.mrb[12].mxu0  ;;  %v1383_v52 = vpop.permute.xlu1 %1382 }
 0x17a   : > { %v1490_v60 = vmul.f32 %v1353_v57, %v991_v55  ;;  %v2907_v62 = vpop.f32.mrb[12].mxu1  ;;  %v2796_v63 = vpop.f32.mrb[13].mxu0 }
 0x17b   : > { %v2908_v1 = vpop.f32.mrb[13].mxu1  ;;  %v2797_v2 = vadd.f32 %v2796_v63, %v2795_v61  ;;  %v2798_v4 = vpop.f32.mrb[14].mxu0 }
 0x17c   : > { %v2909_v3 = vadd.f32 %v2908_v1, %v2907_v62  ;;  %v2910_v5 = vpop.f32.mrb[14].mxu1  ;;  %v1519_v6 = vpack.c.bf16 %v1490_v60, %v1489_v59  ;;  %v2799_v7 = vpop.f32.mrb[15].mxu0 }
 0x17d   : > { %v2911_v8 = vpop.f32.mrb[15].mxu1  ;;  %v2800_v10 = vadd.f32 %v2799_v7, %v2798_v4  ;;  %v1388_v7 = vpop.permute.xlu0 %1387 }
 0x17e   : > { %v996_v9 = vadd.f32 %v2909_v3, %v2797_v2  ;;  %v2912_v11 = vadd.f32 %v2911_v8, %v2910_v5  ;;  %1694 = vmatmul.mubr.bf16.gmra.mrb[72].mxu0 %v1519_v6  ;;  %v1393_v8 = vpop.permute.xlu1 %1392 }
 0x17f   : > { %1703 = vmatprep.mubr.bf16.mxu0 %v3507_v0 }
 0x180   : > { %v999_v12 = vadd.f32 %v2912_v11, %v2800_v10  ;;  %v1491_v15 = vmul.f32 %v1358_v13, %v996_v9 }
 0x181   : > { %v2801_v17 = vpop.f32.mrb[16].mxu0 }
 0x182   : > { %v1492_v16 = vmul.f32 %v1363_v14, %v999_v12  ;;  %v2913_v18 = vpop.f32.mrb[16].mxu1  ;;  %v2802_v19 = vpop.f32.mrb[17].mxu0 }
 0x183   : > { %v2914_v20 = vpop.f32.mrb[17].mxu1  ;;  %v2803_v21 = vadd.f32 %v2802_v19, %v2801_v17  ;;  %v2804_v23 = vpop.f32.mrb[18].mxu0 }
 0x184   : > { %v2915_v22 = vadd.f32 %v2914_v20, %v2913_v18  ;;  %v2916_v24 = vpop.f32.mrb[18].mxu1  ;;  %v1520_v25 = vpack.c.bf16 %v1492_v16, %v1491_v15  ;;  %v2805_v26 = vpop.f32.mrb[19].mxu0 }
 0x185   : > { %v2917_v27 = vpop.f32.mrb[19].mxu1  ;;  %v2806_v29 = vadd.f32 %v2805_v26, %v2804_v23  ;;  %v1398_v26 = vpop.permute.xlu0 %1397 }
 0x186   : > { %v1004_v28 = vadd.f32 %v2915_v22, %v2803_v21  ;;  %v2918_v30 = vadd.f32 %v2917_v27, %v2916_v24  ;;  %1704 = vmatmul.mubr.bf16.gmra.mrb[76].mxu0 %v1520_v25  ;;  %v1403_v27 = vpop.permute.xlu1 %1402 }
 0x187   : > { %1713 = vmatprep.mubr.bf16.mxu0 %v3507_v0 }
 0x188   : > { %v1007_v31 = vadd.f32 %v2918_v30, %v2806_v29  ;;  %v1493_v34 = vmul.f32 %v1368_v32, %v1004_v28 }
 0x189   : > { %v2807_v36 = vpop.f32.mrb[20].mxu0 }
 0x18a   : > { %v1494_v35 = vmul.f32 %v1373_v33, %v1007_v31  ;;  %v2919_v37 = vpop.f32.mrb[20].mxu1  ;;  %v2808_v38 = vpop.f32.mrb[21].mxu0 }
 0x18b   : > { %v2920_v39 = vpop.f32.mrb[21].mxu1  ;;  %v2809_v40 = vadd.f32 %v2808_v38, %v2807_v36  ;;  %v2810_v42 = vpop.f32.mrb[22].mxu0 }
 0x18c   : > { %v2921_v41 = vadd.f32 %v2920_v39, %v2919_v37  ;;  %v2922_v43 = vpop.f32.mrb[22].mxu1  ;;  %v1521_v44 = vpack.c.bf16 %v1494_v35, %v1493_v34  ;;  %v2811_v45 = vpop.f32.mrb[23].mxu0 }
 0x18d   : > { %v2923_v46 = vpop.f32.mrb[23].mxu1  ;;  %v2812_v48 = vadd.f32 %v2811_v45, %v2810_v42  ;;  %v1408_v45 = vpop.permute.xlu0 %1407 }
 0x18e   : > { %v1012_v47 = vadd.f32 %v2921_v41, %v2809_v40  ;;  %v2924_v49 = vadd.f32 %v2923_v46, %v2922_v43  ;;  %1714 = vmatmul.mubr.bf16.gmra.mrb[80].mxu0 %v1521_v44  ;;  %v1413_v46 = vpop.permute.xlu1 %1412 }
 0x18f   : > { %1723 = vmatprep.mubr.bf16.mxu0 %v3507_v0 }
 0x190   : > { %v1015_v50 = vadd.f32 %v2924_v49, %v2812_v48  ;;  %v1495_v53 = vmul.f32 %v1378_v51, %v1012_v47 }
 0x191   : > { %v2813_v55 = vpop.f32.mrb[24].mxu0 }
 0x192   : > { %v1496_v54 = vmul.f32 %v1383_v52, %v1015_v50  ;;  %v2925_v56 = vpop.f32.mrb[24].mxu1  ;;  %v2814_v57 = vpop.f32.mrb[25].mxu0 }
 0x193   : > { %v2926_v58 = vpop.f32.mrb[25].mxu1  ;;  %v2815_v59 = vadd.f32 %v2814_v57, %v2813_v55  ;;  %v2816_v61 = vpop.f32.mrb[26].mxu0 }
 0x194   : > { %v2927_v60 = vadd.f32 %v2926_v58, %v2925_v56  ;;  %v2928_v62 = vpop.f32.mrb[26].mxu1  ;;  %v1522_v63 = vpack.c.bf16 %v1496_v54, %v1495_v53  ;;  %v2817_v1 = vpop.f32.mrb[27].mxu0 }
 0x195   : > { %v2929_v2 = vpop.f32.mrb[27].mxu1  ;;  %v2818_v4 = vadd.f32 %v2817_v1, %v2816_v61  ;;  %v1418_v1 = vpop.permute.xlu0 %1417 }
 0x196   : > { %v1020_v3 = vadd.f32 %v2927_v60, %v2815_v59  ;;  %v2930_v5 = vadd.f32 %v2929_v2, %v2928_v62  ;;  %1724 = vmatmul.mubr.bf16.gmra.mrb[84].mxu0 %v1522_v63  ;;  %v1423_v2 = vpop.permute.xlu1 %1422 }
 0x197   : > { %1733 = vmatprep.mubr.bf16.mxu0 %v3507_v0 }
 0x198   : > { %v1023_v6 = vadd.f32 %v2930_v5, %v2818_v4  ;;  %v1497_v9 = vmul.f32 %v1388_v7, %v1020_v3 }
 0x199   : > { %v2819_v11 = vpop.f32.mrb[28].mxu0 }
 0x19a   : > { %v1498_v10 = vmul.f32 %v1393_v8, %v1023_v6  ;;  %v2931_v12 = vpop.f32.mrb[28].mxu1  ;;  %v2820_v13 = vpop.f32.mrb[29].mxu0 }
 0x19b   : > { %v2932_v14 = vpop.f32.mrb[29].mxu1  ;;  %v2821_v15 = vadd.f32 %v2820_v13, %v2819_v11  ;;  %v2822_v17 = vpop.f32.mrb[30].mxu0 }
 0x19c   : > { %v2933_v16 = vadd.f32 %v2932_v14, %v2931_v12  ;;  %v2934_v18 = vpop.f32.mrb[30].mxu1  ;;  %v1523_v19 = vpack.c.bf16 %v1498_v10, %v1497_v9  ;;  %v2823_v20 = vpop.f32.mrb[31].mxu0 }
 0x19d   : > { %v2935_v21 = vpop.f32.mrb[31].mxu1  ;;  %v2824_v23 = vadd.f32 %v2823_v20, %v2822_v17  ;;  %v1428_v20 = vpop.permute.xlu0 %1427 }
 0x19e   : > { %v1028_v22 = vadd.f32 %v2933_v16, %v2821_v15  ;;  %v2936_v24 = vadd.f32 %v2935_v21, %v2934_v18  ;;  %1734 = vmatmul.mubr.bf16.gmra.mrb[88].mxu0 %v1523_v19  ;;  %v1433_v21 = vpop.permute.xlu1 %1432 }
 0x19f   : > { %1743 = vmatprep.mubr.bf16.mxu0 %v3507_v0 }
 0x1a0   : > { %v1031_v25 = vadd.f32 %v2936_v24, %v2824_v23  ;;  %v1499_v28 = vmul.f32 %v1398_v26, %v1028_v22 }
 0x1a1   : > { %v2825_v30 = vpop.f32.mrb[32].mxu0 }
 0x1a2   : > { %v1500_v29 = vmul.f32 %v1403_v27, %v1031_v25  ;;  %v2937_v31 = vpop.f32.mrb[32].mxu1  ;;  %v2826_v32 = vpop.f32.mrb[33].mxu0 }
 0x1a3   : > { %v2938_v33 = vpop.f32.mrb[33].mxu1  ;;  %v2827_v34 = vadd.f32 %v2826_v32, %v2825_v30  ;;  %v2828_v36 = vpop.f32.mrb[34].mxu0 }
 0x1a4   : > { %v2939_v35 = vadd.f32 %v2938_v33, %v2937_v31  ;;  %v2940_v37 = vpop.f32.mrb[34].mxu1  ;;  %v1524_v38 = vpack.c.bf16 %v1500_v29, %v1499_v28  ;;  %v2829_v39 = vpop.f32.mrb[35].mxu0 }
 0x1a5   : > { %v2941_v40 = vpop.f32.mrb[35].mxu1  ;;  %v2830_v42 = vadd.f32 %v2829_v39, %v2828_v36  ;;  %v1438_v39 = vpop.permute.xlu0 %1437 }
 0x1a6   : > { %v1036_v41 = vadd.f32 %v2939_v35, %v2827_v34  ;;  %v2942_v43 = vadd.f32 %v2941_v40, %v2940_v37  ;;  %1744 = vmatmul.mubr.bf16.gmra.mrb[92].mxu0 %v1524_v38  ;;  %v1443_v40 = vpop.permute.xlu1 %1442 }
 0x1a7   : > { %1753 = vmatprep.mubr.bf16.mxu0 %v3507_v0 }
 0x1a8   : > { %v1039_v44 = vadd.f32 %v2942_v43, %v2830_v42  ;;  %v1501_v47 = vmul.f32 %v1408_v45, %v1036_v41 }
 0x1a9   : > { %v2831_v49 = vpop.f32.mrb[36].mxu0 }
 0x1aa   : > { %v1502_v48 = vmul.f32 %v1413_v46, %v1039_v44  ;;  %v2943_v50 = vpop.f32.mrb[36].mxu1  ;;  %v2832_v51 = vpop.f32.mrb[37].mxu0 }
 0x1ab   : > { %v2944_v52 = vpop.f32.mrb[37].mxu1  ;;  %v2833_v53 = vadd.f32 %v2832_v51, %v2831_v49  ;;  %v2834_v55 = vpop.f32.mrb[38].mxu0 }
 0x1ac   : > { %v2945_v54 = vadd.f32 %v2944_v52, %v2943_v50  ;;  %v2946_v56 = vpop.f32.mrb[38].mxu1  ;;  %v1525_v57 = vpack.c.bf16 %v1502_v48, %v1501_v47  ;;  %v2835_v58 = vpop.f32.mrb[39].mxu0 }
 0x1ad   : > { %v2947_v59 = vpop.f32.mrb[39].mxu1  ;;  %v2836_v61 = vadd.f32 %v2835_v58, %v2834_v55  ;;  %v1448_v58 = vpop.permute.xlu0 %1447 }
 0x1ae   : > { %v1044_v60 = vadd.f32 %v2945_v54, %v2833_v53  ;;  %v2948_v62 = vadd.f32 %v2947_v59, %v2946_v56  ;;  %1754 = vmatmul.mubr.bf16.gmra.mrb[96].mxu0 %v1525_v57  ;;  %v1453_v59 = vpop.permute.xlu1 %1452 }
 0x1af   : > { %1763 = vmatprep.mubr.bf16.mxu0 %v3507_v0 }
 0x1b0   : > { %v1047_v63 = vadd.f32 %v2948_v62, %v2836_v61  ;;  %v1503_v3 = vmul.f32 %v1418_v1, %v1044_v60 }
 0x1b1   : > { %v2837_v5 = vpop.f32.mrb[40].mxu0 }
 0x1b2   : > { %v1504_v4 = vmul.f32 %v1423_v2, %v1047_v63  ;;  %v2949_v6 = vpop.f32.mrb[40].mxu1  ;;  %v2838_v7 = vpop.f32.mrb[41].mxu0 }
 0x1b3   : > { %v2950_v8 = vpop.f32.mrb[41].mxu1  ;;  %v2839_v9 = vadd.f32 %v2838_v7, %v2837_v5  ;;  %v2840_v11 = vpop.f32.mrb[42].mxu0 }
 0x1b4   : > { %v2951_v10 = vadd.f32 %v2950_v8, %v2949_v6  ;;  %v2952_v12 = vpop.f32.mrb[42].mxu1  ;;  %v1526_v13 = vpack.c.bf16 %v1504_v4, %v1503_v3  ;;  %v2841_v14 = vpop.f32.mrb[43].mxu0 }
 0x1b5   : > { %v2953_v15 = vpop.f32.mrb[43].mxu1  ;;  %v2842_v17 = vadd.f32 %v2841_v14, %v2840_v11  ;;  %v1458_v14 = vpop.permute.xlu0 %1457 }
 0x1b6   : > { %v1052_v16 = vadd.f32 %v2951_v10, %v2839_v9  ;;  %v2954_v18 = vadd.f32 %v2953_v15, %v2952_v12  ;;  %1764 = vmatmul.mubr.bf16.gmra.mrb[100].mxu0 %v1526_v13  ;;  %v1463_v15 = vpop.permute.xlu1 %1462 }
 0x1b7   : > { %1773 = vmatprep.mubr.bf16.mxu0 %v3507_v0 }
 0x1b8   : > { %v1055_v19 = vadd.f32 %v2954_v18, %v2842_v17  ;;  %v1505_v22 = vmul.f32 %v1428_v20, %v1052_v16 }
 0x1b9   : > { %v2843_v24 = vpop.f32.mrb[44].mxu0 }
 0x1ba   : > { %v1506_v23 = vmul.f32 %v1433_v21, %v1055_v19  ;;  %v2955_v25 = vpop.f32.mrb[44].mxu1  ;;  %v2844_v26 = vpop.f32.mrb[45].mxu0 }
 0x1bb   : > { %v2956_v27 = vpop.f32.mrb[45].mxu1  ;;  %v2845_v28 = vadd.f32 %v2844_v26, %v2843_v24  ;;  %v2846_v30 = vpop.f32.mrb[46].mxu0 }
 0x1bc   : > { %v2957_v29 = vadd.f32 %v2956_v27, %v2955_v25  ;;  %v2958_v31 = vpop.f32.mrb[46].mxu1  ;;  %v1527_v32 = vpack.c.bf16 %v1506_v23, %v1505_v22  ;;  %v2847_v33 = vpop.f32.mrb[47].mxu0 }
 0x1bd   : > { %v2959_v34 = vpop.f32.mrb[47].mxu1  ;;  %v2848_v36 = vadd.f32 %v2847_v33, %v2846_v30  ;;  %v1468_v33 = vpop.permute.xlu0 %1467 }
 0x1be   : > { %v1060_v35 = vadd.f32 %v2957_v29, %v2845_v28  ;;  %v2960_v37 = vadd.f32 %v2959_v34, %v2958_v31  ;;  %1774 = vmatmul.mubr.bf16.gmra.mrb[104].mxu0 %v1527_v32  ;;  %v1473_v34 = vpop.permute.xlu1 %1472 }
 0x1bf   : > { %1783 = vmatprep.mubr.bf16.mxu0 %v3507_v0 }
 0x1c0   : > { %v1063_v38 = vadd.f32 %v2960_v37, %v2848_v36  ;;  %v1507_v41 = vmul.f32 %v1438_v39, %v1060_v35 }
 0x1c1   : > { %v2849_v43 = vpop.f32.mrb[48].mxu0 }
 0x1c2   : > { %v1508_v42 = vmul.f32 %v1443_v40, %v1063_v38  ;;  %v2961_v44 = vpop.f32.mrb[48].mxu1  ;;  %v2850_v45 = vpop.f32.mrb[49].mxu0 }
 0x1c3   : > { %v2962_v46 = vpop.f32.mrb[49].mxu1  ;;  %v2851_v47 = vadd.f32 %v2850_v45, %v2849_v43  ;;  %v2852_v49 = vpop.f32.mrb[50].mxu0 }
 0x1c4   : > { %v2963_v48 = vadd.f32 %v2962_v46, %v2961_v44  ;;  %v2964_v50 = vpop.f32.mrb[50].mxu1  ;;  %v1528_v51 = vpack.c.bf16 %v1508_v42, %v1507_v41  ;;  %v2853_v52 = vpop.f32.mrb[51].mxu0 }
 0x1c5   : > { %v2965_v53 = vpop.f32.mrb[51].mxu1  ;;  %v2854_v55 = vadd.f32 %v2853_v52, %v2852_v49  ;;  %v1478_v52 = vpop.permute.xlu0 %1477 }
 0x1c6   : > { %v1068_v54 = vadd.f32 %v2963_v48, %v2851_v47  ;;  %v2966_v56 = vadd.f32 %v2965_v53, %v2964_v50  ;;  %1784 = vmatmul.mubr.bf16.gmra.mrb[108].mxu0 %v1528_v51  ;;  %v1483_v53 = vpop.permute.xlu1 %1482 }
 0x1c7   : > { %1793 = vmatprep.mubr.bf16.mxu0 %v3507_v0 }
 0x1c8   : > { %v1071_v57 = vadd.f32 %v2966_v56, %v2854_v55  ;;  %v1509_v60 = vmul.f32 %v1448_v58, %v1068_v54 }
 0x1c9   : > { %v2855_v62 = vpop.f32.mrb[52].mxu0 }
 0x1ca   : > { %v1510_v61 = vmul.f32 %v1453_v59, %v1071_v57  ;;  %v2967_v63 = vpop.f32.mrb[52].mxu1  ;;  %v2856_v1 = vpop.f32.mrb[53].mxu0  ;;  %v1551_v57 = vlaneseq }
 0x1cb   : > { %v2968_v2 = vpop.f32.mrb[53].mxu1  ;;  %v2857_v3 = vadd.f32 %v2856_v1, %v2855_v62  ;;  %v2858_v5 = vpop.f32.mrb[54].mxu0 }
 0x1cc   : > { %v2969_v4 = vadd.f32 %v2968_v2, %v2967_v63  ;;  %v2970_v6 = vpop.f32.mrb[54].mxu1  ;;  %v1529_v7 = vpack.c.bf16 %v1510_v61, %v1509_v60  ;;  %v2859_v8 = vpop.f32.mrb[55].mxu0  ;;  %v1552_v58 = vshrl.u32 %v1551_v57, 7  ;;  %v1549_v60 = vld [vmem:[%s3964_s4] sm:$0x3] }
 0x1cd   : > { %v2971_v9 = vpop.f32.mrb[55].mxu1  ;;  %v2860_v11 = vadd.f32 %v2859_v8, %v2858_v5 }
 0x1ce   : > { %v1076_v10 = vadd.f32 %v2969_v4, %v2857_v3  ;;  %v2972_v12 = vadd.f32 %v2971_v9, %v2970_v6  ;;  %1794 = vmatmul.mubr.bf16.gmra.mrb[112].mxu0 %v1529_v7  ;;  %v1553_v59 = vsub.s32 0, %v1552_v58  ;;  %v1557_v61 = vsub.s32 1, %v1552_v58 }
 0x1cf   : > { %1803 = vmatprep.mubr.bf16.mxu0 %v3507_v0 }
 0x1d0   : > { %v1079_v13 = vadd.f32 %v2972_v12, %v2860_v11  ;;  %v1511_v16 = vmul.f32 %v1458_v14, %v1076_v10  ;;  %v3814_v62 = vrot.slane %v1549_v60, %v1553_v59  ;;  %v3816_v63 = vrot.slane %v1549_v60, %v1557_v61 }
 0x1d1   : > { %v2861_v18 = vpop.f32.mrb[56].mxu0 }
 0x1d2   : > { %v1512_v17 = vmul.f32 %v1463_v15, %v1079_v13  ;;  %v2973_v19 = vpop.f32.mrb[56].mxu1  ;;  %v2862_v20 = vpop.f32.mrb[57].mxu0 }
 0x1d3   : > { %v2974_v21 = vpop.f32.mrb[57].mxu1  ;;  %v2863_v22 = vadd.f32 %v2862_v20, %v2861_v18  ;;  %v2864_v24 = vpop.f32.mrb[58].mxu0 }
 0x1d4   : > { %v2975_v23 = vadd.f32 %v2974_v21, %v2973_v19  ;;  %v2976_v25 = vpop.f32.mrb[58].mxu1  ;;  %v1530_v26 = vpack.c.bf16 %v1512_v17, %v1511_v16  ;;  %v2865_v27 = vpop.f32.mrb[59].mxu0 }
 0x1d5   : > { %v2977_v28 = vpop.f32.mrb[59].mxu1  ;;  %v2866_v30 = vadd.f32 %v2865_v27, %v2864_v24 }
 0x1d6   : > { %v1084_v29 = vadd.f32 %v2975_v23, %v2863_v22  ;;  %v2978_v31 = vadd.f32 %v2977_v28, %v2976_v25  ;;  %1804 = vmatmul.mubr.bf16.gmra.mrb[116].mxu0 %v1530_v26 }
 0x1d7   : > { %1813 = vmatprep.mubr.bf16.mxu0 %v3507_v0 }
 0x1d8   : > { %v1087_v32 = vadd.f32 %v2978_v31, %v2866_v30  ;;  %v1513_v35 = vmul.f32 %v1468_v33, %v1084_v29 }
 0x1d9   : > { %v2867_v37 = vpop.f32.mrb[60].mxu0 }
 0x1da   : > { %v1514_v36 = vmul.f32 %v1473_v34, %v1087_v32  ;;  %v2979_v38 = vpop.f32.mrb[60].mxu1  ;;  %v2868_v39 = vpop.f32.mrb[61].mxu0 }
 0x1db   : > { %v2980_v40 = vpop.f32.mrb[61].mxu1  ;;  %v2869_v41 = vadd.f32 %v2868_v39, %v2867_v37  ;;  %v2870_v43 = vpop.f32.mrb[62].mxu0 }
 0x1dc   : > { %v2981_v42 = vadd.f32 %v2980_v40, %v2979_v38  ;;  %v2982_v44 = vpop.f32.mrb[62].mxu1  ;;  %v1531_v45 = vpack.c.bf16 %v1514_v36, %v1513_v35  ;;  %v2871_v46 = vpop.f32.mrb[63].mxu0 }
 0x1dd   : > { %v2983_v47 = vpop.f32.mrb[63].mxu1  ;;  %v2872_v49 = vadd.f32 %v2871_v46, %v2870_v43 }
 0x1de   : > { %v1092_v48 = vadd.f32 %v2981_v42, %v2869_v41  ;;  %v2984_v50 = vadd.f32 %v2983_v47, %v2982_v44  ;;  %1814 = vmatmul.mubr.bf16.gmra.mrb[120].mxu0 %v1531_v45 }
 0x1df   : > { %1823 = vmatprep.mubr.bf16.mxu0 %v3507_v0 }
 0x1e0   : > { %v1095_v51 = vadd.f32 %v2984_v50, %v2872_v49  ;;  %v1515_v54 = vmul.f32 %v1478_v52, %v1092_v48 }
 0x1e2   : > { %v1516_v55 = vmul.f32 %v1483_v53, %v1095_v51 }
 0x1e4   : > { %v1532_v56 = vpack.c.bf16 %v1516_v55, %v1515_v54 }
 0x1e6   : > { %1824 = vmatmul.mubr.bf16.gmra.mrb[124].mxu0 %v1532_v56 }
 0x241   : > { %v1675_v0 = vpop.f32.mrb[64].mxu0 }
 0x242   : > { %v1676_v1 = vadd.f32 %v1675_v0, %v3814_v62  ;;  %v1677_v2 = vpop.f32.mrb[65].mxu0 }
 0x243   : > { %v1678_v3 = vadd.f32 %v1677_v2, %v3816_v63  ;;  %v1679_v4 = vpop.f32.mrb[66].mxu0 }
 0x244   : > { %v1680_v5 = vadd.f32 %v1679_v4, %v3814_v62  ;;  %v1681_v6 = vpop.f32.mrb[67].mxu0  ;;  %v1834_v8 = vmax.f32 %v1676_v1, 0.0 }
 0x245   : > { %v1682_v7 = vadd.f32 %v1681_v6, %v3816_v63  ;;  %v1835_v10 = vmax.f32 %v1678_v3, 0.0 }
 0x246   : > { %v1836_v9 = vmax.f32 %v1680_v5, 0.0 }
 0x247   : > { %v1837_v11 = vmax.f32 %v1682_v7, 0.0 }
 0x248   : > { %v1898_v12 = vpack.c.bf16 %v1836_v9, %v1834_v8 }
 0x249   : > { %v1899_v13 = vpack.c.bf16 %v1837_v11, %v1835_v10  ;;  %v1685_v14 = vpop.f32.mrb[68].mxu0 }
 0x24a   : > { %v1686_v15 = vadd.f32 %v1685_v14, %v3814_v62  ;;  %v1687_v16 = vpop.f32.mrb[69].mxu0 }
 0x24b   : > { %v1688_v17 = vadd.f32 %v1687_v16, %v3816_v63  ;;  %v1689_v18 = vpop.f32.mrb[70].mxu0  ;;  %2090 = vmatprep.mubr.bf16.mxu1 %v1899_v13 }
 0x24c   : > { %v1690_v19 = vadd.f32 %v1689_v18, %v3814_v62  ;;  %v1691_v20 = vpop.f32.mrb[71].mxu0  ;;  %2091 = vmatmul.mubr.bf16.vlgmr.msra.gmra.mrb[64].mxu1 %v1898_v12  ;;  %v1838_v22 = vmax.f32 %v1686_v15, 0.0 }
 0x24d   : > { %v1692_v21 = vadd.f32 %v1691_v20, %v3816_v63  ;;  %v1839_v24 = vmax.f32 %v1688_v17, 0.0 }
 0x24e   : > { %v1840_v23 = vmax.f32 %v1690_v19, 0.0 }
 0x24f   : > { %v1841_v25 = vmax.f32 %v1692_v21, 0.0 }
 0x250   : > { %v1900_v26 = vpack.c.bf16 %v1840_v23, %v1838_v22 }
 0x251   : > { %v1901_v27 = vpack.c.bf16 %v1841_v25, %v1839_v24  ;;  %v1695_v28 = vpop.f32.mrb[72].mxu0 }
 0x252   : > { %v1696_v29 = vadd.f32 %v1695_v28, %v3814_v62  ;;  %v1697_v30 = vpop.f32.mrb[73].mxu0 }
 0x253   : > { %v1698_v31 = vadd.f32 %v1697_v30, %v3816_v63  ;;  %v1699_v32 = vpop.f32.mrb[74].mxu0  ;;  %2098 = vmatprep.mubr.bf16.mxu1 %v1901_v27 }
 0x254   : > { %v1700_v33 = vadd.f32 %v1699_v32, %v3814_v62  ;;  %v1701_v34 = vpop.f32.mrb[75].mxu0  ;;  %2099 = vmatmul.mubr.bf16.gmra.mrb[68].mxu1 %v1900_v26  ;;  %v1842_v36 = vmax.f32 %v1696_v29, 0.0 }
 0x255   : > { %v1702_v35 = vadd.f32 %v1701_v34, %v3816_v63  ;;  %v1843_v38 = vmax.f32 %v1698_v31, 0.0 }
 0x256   : > { %v1844_v37 = vmax.f32 %v1700_v33, 0.0 }
 0x257   : > { %v1845_v39 = vmax.f32 %v1702_v35, 0.0 }
 0x258   : > { %v1902_v40 = vpack.c.bf16 %v1844_v37, %v1842_v36 }
 0x259   : > { %v1903_v41 = vpack.c.bf16 %v1845_v39, %v1843_v38  ;;  %v1705_v42 = vpop.f32.mrb[76].mxu0 }
 0x25a   : > { %v1706_v43 = vadd.f32 %v1705_v42, %v3814_v62  ;;  %v1707_v44 = vpop.f32.mrb[77].mxu0 }
 0x25b   : > { %v1708_v45 = vadd.f32 %v1707_v44, %v3816_v63  ;;  %v1709_v46 = vpop.f32.mrb[78].mxu0  ;;  %2106 = vmatprep.mubr.bf16.mxu1 %v1903_v41 }
 0x25c   : > { %v1710_v47 = vadd.f32 %v1709_v46, %v3814_v62  ;;  %v1711_v48 = vpop.f32.mrb[79].mxu0  ;;  %2107 = vmatmul.mubr.bf16.gmra.mrb[72].mxu1 %v1902_v40  ;;  %v1846_v50 = vmax.f32 %v1706_v43, 0.0 }
 0x25d   : > { %v1712_v49 = vadd.f32 %v1711_v48, %v3816_v63  ;;  %v1847_v52 = vmax.f32 %v1708_v45, 0.0 }
 0x25e   : > { %v1848_v51 = vmax.f32 %v1710_v47, 0.0 }
 0x25f   : > { %v1849_v53 = vmax.f32 %v1712_v49, 0.0 }
 0x260   : > { %v1904_v54 = vpack.c.bf16 %v1848_v51, %v1846_v50 }
 0x261   : > { %v1905_v55 = vpack.c.bf16 %v1849_v53, %v1847_v52  ;;  %v1715_v56 = vpop.f32.mrb[80].mxu0 }
 0x262   : > { %v1716_v57 = vadd.f32 %v1715_v56, %v3814_v62  ;;  %v1717_v58 = vpop.f32.mrb[81].mxu0 }
 0x263   : > { %v1718_v59 = vadd.f32 %v1717_v58, %v3816_v63  ;;  %v1719_v60 = vpop.f32.mrb[82].mxu0  ;;  %2114 = vmatprep.mubr.bf16.mxu1 %v1905_v55 }
 0x264   : > { %v1720_v61 = vadd.f32 %v1719_v60, %v3814_v62  ;;  %v1721_v0 = vpop.f32.mrb[83].mxu0  ;;  %2115 = vmatmul.mubr.bf16.gmra.mrb[76].mxu1 %v1904_v54  ;;  %v1850_v2 = vmax.f32 %v1716_v57, 0.0 }
 0x265   : > { %v1722_v1 = vadd.f32 %v1721_v0, %v3816_v63  ;;  %v1851_v4 = vmax.f32 %v1718_v59, 0.0 }
 0x266   : > { %v1852_v3 = vmax.f32 %v1720_v61, 0.0 }
 0x267   : > { %v1853_v5 = vmax.f32 %v1722_v1, 0.0 }
 0x268   : > { %v1906_v6 = vpack.c.bf16 %v1852_v3, %v1850_v2 }
 0x269   : > { %v1907_v7 = vpack.c.bf16 %v1853_v5, %v1851_v4  ;;  %v1725_v8 = vpop.f32.mrb[84].mxu0 }
 0x26a   : > { %v1726_v9 = vadd.f32 %v1725_v8, %v3814_v62  ;;  %v1727_v10 = vpop.f32.mrb[85].mxu0 }
 0x26b   : > { %v1728_v11 = vadd.f32 %v1727_v10, %v3816_v63  ;;  %v1729_v12 = vpop.f32.mrb[86].mxu0  ;;  %2122 = vmatprep.mubr.bf16.mxu1 %v1907_v7 }
 0x26c   : > { %v1730_v13 = vadd.f32 %v1729_v12, %v3814_v62  ;;  %v1731_v14 = vpop.f32.mrb[87].mxu0  ;;  %2123 = vmatmul.mubr.bf16.gmra.mrb[80].mxu1 %v1906_v6  ;;  %v1854_v16 = vmax.f32 %v1726_v9, 0.0 }
 0x26d   : > { %v1732_v15 = vadd.f32 %v1731_v14, %v3816_v63  ;;  %v1855_v18 = vmax.f32 %v1728_v11, 0.0 }
 0x26e   : > { %v1856_v17 = vmax.f32 %v1730_v13, 0.0 }
 0x26f   : > { %v1857_v19 = vmax.f32 %v1732_v15, 0.0 }
 0x270   : > { %v1908_v20 = vpack.c.bf16 %v1856_v17, %v1854_v16 }
 0x271   : > { %v1909_v21 = vpack.c.bf16 %v1857_v19, %v1855_v18  ;;  %v1735_v22 = vpop.f32.mrb[88].mxu0 }
 0x272   : > { %v1736_v23 = vadd.f32 %v1735_v22, %v3814_v62  ;;  %v1737_v24 = vpop.f32.mrb[89].mxu0 }
 0x273   : > { %v1738_v25 = vadd.f32 %v1737_v24, %v3816_v63  ;;  %v1739_v26 = vpop.f32.mrb[90].mxu0  ;;  %2130 = vmatprep.mubr.bf16.mxu1 %v1909_v21 }
 0x274   : > { %v1740_v27 = vadd.f32 %v1739_v26, %v3814_v62  ;;  %v1741_v28 = vpop.f32.mrb[91].mxu0  ;;  %2131 = vmatmul.mubr.bf16.gmra.mrb[84].mxu1 %v1908_v20  ;;  %v1858_v30 = vmax.f32 %v1736_v23, 0.0 }
 0x275   : > { %v1742_v29 = vadd.f32 %v1741_v28, %v3816_v63  ;;  %v1859_v32 = vmax.f32 %v1738_v25, 0.0 }
 0x276   : > { %v1860_v31 = vmax.f32 %v1740_v27, 0.0 }
 0x277   : > { %v1861_v33 = vmax.f32 %v1742_v29, 0.0 }
 0x278   : > { %v1910_v34 = vpack.c.bf16 %v1860_v31, %v1858_v30 }
 0x279   : > { %v1911_v35 = vpack.c.bf16 %v1861_v33, %v1859_v32  ;;  %v1745_v36 = vpop.f32.mrb[92].mxu0 }
 0x27a   : > { %v1746_v37 = vadd.f32 %v1745_v36, %v3814_v62  ;;  %v1747_v38 = vpop.f32.mrb[93].mxu0 }
 0x27b   : > { %v1748_v39 = vadd.f32 %v1747_v38, %v3816_v63  ;;  %v1749_v40 = vpop.f32.mrb[94].mxu0  ;;  %2138 = vmatprep.mubr.bf16.mxu1 %v1911_v35 }
 0x27c   : > { %v1750_v41 = vadd.f32 %v1749_v40, %v3814_v62  ;;  %v1751_v42 = vpop.f32.mrb[95].mxu0  ;;  %2139 = vmatmul.mubr.bf16.gmra.mrb[88].mxu1 %v1910_v34  ;;  %v1862_v44 = vmax.f32 %v1746_v37, 0.0 }
 0x27d   : > { %v1752_v43 = vadd.f32 %v1751_v42, %v3816_v63  ;;  %v1863_v46 = vmax.f32 %v1748_v39, 0.0 }
 0x27e   : > { %v1864_v45 = vmax.f32 %v1750_v41, 0.0 }
 0x27f   : > { %v1865_v47 = vmax.f32 %v1752_v43, 0.0 }
 0x280   : > { %v1912_v48 = vpack.c.bf16 %v1864_v45, %v1862_v44 }
 0x281   : > { %v1913_v49 = vpack.c.bf16 %v1865_v47, %v1863_v46  ;;  %v1755_v50 = vpop.f32.mrb[96].mxu0 }
 0x282   : > { %v1756_v51 = vadd.f32 %v1755_v50, %v3814_v62  ;;  %v1757_v52 = vpop.f32.mrb[97].mxu0 }
 0x283   : > { %v1758_v53 = vadd.f32 %v1757_v52, %v3816_v63  ;;  %v1759_v54 = vpop.f32.mrb[98].mxu0  ;;  %2146 = vmatprep.mubr.bf16.mxu1 %v1913_v49 }
 0x284   : > { %v1760_v55 = vadd.f32 %v1759_v54, %v3814_v62  ;;  %v1761_v56 = vpop.f32.mrb[99].mxu0  ;;  %2147 = vmatmul.mubr.bf16.gmra.mrb[92].mxu1 %v1912_v48  ;;  %v1866_v58 = vmax.f32 %v1756_v51, 0.0 }
 0x285   : > { %v1762_v57 = vadd.f32 %v1761_v56, %v3816_v63  ;;  %v1867_v60 = vmax.f32 %v1758_v53, 0.0 }
 0x286   : > { %v1868_v59 = vmax.f32 %v1760_v55, 0.0 }
 0x287   : > { %v1869_v61 = vmax.f32 %v1762_v57, 0.0 }
 0x288   : > { %v1914_v0 = vpack.c.bf16 %v1868_v59, %v1866_v58 }
 0x289   : > { %v1915_v1 = vpack.c.bf16 %v1869_v61, %v1867_v60  ;;  %v1765_v2 = vpop.f32.mrb[100].mxu0 }
 0x28a   : > { %v1766_v3 = vadd.f32 %v1765_v2, %v3814_v62  ;;  %v1767_v4 = vpop.f32.mrb[101].mxu0 }
 0x28b   : > { %v1768_v5 = vadd.f32 %v1767_v4, %v3816_v63  ;;  %v1769_v6 = vpop.f32.mrb[102].mxu0  ;;  %2154 = vmatprep.mubr.bf16.mxu1 %v1915_v1 }
 0x28c   : > { %v1770_v7 = vadd.f32 %v1769_v6, %v3814_v62  ;;  %v1771_v8 = vpop.f32.mrb[103].mxu0  ;;  %2155 = vmatmul.mubr.bf16.gmra.mrb[96].mxu1 %v1914_v0  ;;  %v1870_v10 = vmax.f32 %v1766_v3, 0.0 }
 0x28d   : > { %v1772_v9 = vadd.f32 %v1771_v8, %v3816_v63  ;;  %v1871_v12 = vmax.f32 %v1768_v5, 0.0 }
 0x28e   : > { %v1872_v11 = vmax.f32 %v1770_v7, 0.0 }
 0x28f   : > { %v1873_v13 = vmax.f32 %v1772_v9, 0.0 }
 0x290   : > { %v1916_v14 = vpack.c.bf16 %v1872_v11, %v1870_v10 }
 0x291   : > { %v1917_v15 = vpack.c.bf16 %v1873_v13, %v1871_v12  ;;  %v1775_v16 = vpop.f32.mrb[104].mxu0 }
 0x292   : > { %v1776_v17 = vadd.f32 %v1775_v16, %v3814_v62  ;;  %v1777_v18 = vpop.f32.mrb[105].mxu0 }
 0x293   : > { %v1778_v19 = vadd.f32 %v1777_v18, %v3816_v63  ;;  %v1779_v20 = vpop.f32.mrb[106].mxu0  ;;  %2162 = vmatprep.mubr.bf16.mxu1 %v1917_v15 }
 0x294   : > { %v1780_v21 = vadd.f32 %v1779_v20, %v3814_v62  ;;  %v1781_v22 = vpop.f32.mrb[107].mxu0  ;;  %2163 = vmatmul.mubr.bf16.gmra.mrb[100].mxu1 %v1916_v14  ;;  %v1874_v24 = vmax.f32 %v1776_v17, 0.0 }
 0x295   : > { %v1782_v23 = vadd.f32 %v1781_v22, %v3816_v63  ;;  %v1875_v26 = vmax.f32 %v1778_v19, 0.0 }
 0x296   : > { %v1876_v25 = vmax.f32 %v1780_v21, 0.0 }
 0x297   : > { %v1877_v27 = vmax.f32 %v1782_v23, 0.0 }
 0x298   : > { %v1918_v28 = vpack.c.bf16 %v1876_v25, %v1874_v24 }
 0x299   : > { %v1919_v29 = vpack.c.bf16 %v1877_v27, %v1875_v26  ;;  %v1785_v30 = vpop.f32.mrb[108].mxu0 }
 0x29a   : > { %v1786_v31 = vadd.f32 %v1785_v30, %v3814_v62  ;;  %v1787_v32 = vpop.f32.mrb[109].mxu0 }
 0x29b   : > { %v1788_v33 = vadd.f32 %v1787_v32, %v3816_v63  ;;  %v1789_v34 = vpop.f32.mrb[110].mxu0  ;;  %2170 = vmatprep.mubr.bf16.mxu1 %v1919_v29 }
 0x29c   : > { %v1790_v35 = vadd.f32 %v1789_v34, %v3814_v62  ;;  %v1791_v36 = vpop.f32.mrb[111].mxu0  ;;  %2171 = vmatmul.mubr.bf16.gmra.mrb[104].mxu1 %v1918_v28  ;;  %v1878_v38 = vmax.f32 %v1786_v31, 0.0 }
 0x29d   : > { %v1792_v37 = vadd.f32 %v1791_v36, %v3816_v63  ;;  %v1879_v40 = vmax.f32 %v1788_v33, 0.0 }
 0x29e   : > { %v1880_v39 = vmax.f32 %v1790_v35, 0.0 }
 0x29f   : > { %v1881_v41 = vmax.f32 %v1792_v37, 0.0 }
 0x2a0   : > { %v1920_v42 = vpack.c.bf16 %v1880_v39, %v1878_v38 }
 0x2a1   : > { %v1921_v43 = vpack.c.bf16 %v1881_v41, %v1879_v40  ;;  %v1795_v44 = vpop.f32.mrb[112].mxu0 }
 0x2a2   : > { %v1796_v45 = vadd.f32 %v1795_v44, %v3814_v62  ;;  %v1797_v46 = vpop.f32.mrb[113].mxu0 }
 0x2a3   : > { %v1798_v47 = vadd.f32 %v1797_v46, %v3816_v63  ;;  %v1799_v48 = vpop.f32.mrb[114].mxu0  ;;  %2178 = vmatprep.mubr.bf16.mxu1 %v1921_v43 }
 0x2a4   : > { %v1800_v49 = vadd.f32 %v1799_v48, %v3814_v62  ;;  %v1801_v50 = vpop.f32.mrb[115].mxu0  ;;  %2179 = vmatmul.mubr.bf16.gmra.mrb[108].mxu1 %v1920_v42  ;;  %v1882_v52 = vmax.f32 %v1796_v45, 0.0 }
 0x2a5   : > { %v1802_v51 = vadd.f32 %v1801_v50, %v3816_v63  ;;  %v1883_v54 = vmax.f32 %v1798_v47, 0.0 }
 0x2a6   : > { %v1884_v53 = vmax.f32 %v1800_v49, 0.0 }
 0x2a7   : > { %v1885_v55 = vmax.f32 %v1802_v51, 0.0 }
 0x2a8   : > { %v1922_v56 = vpack.c.bf16 %v1884_v53, %v1882_v52 }
 0x2a9   : > { %v1923_v57 = vpack.c.bf16 %v1885_v55, %v1883_v54  ;;  %v1805_v58 = vpop.f32.mrb[116].mxu0 }
 0x2aa   : > { %v1806_v59 = vadd.f32 %v1805_v58, %v3814_v62  ;;  %v1807_v60 = vpop.f32.mrb[117].mxu0 }
 0x2ab   : > { %v1808_v61 = vadd.f32 %v1807_v60, %v3816_v63  ;;  %v1809_v0 = vpop.f32.mrb[118].mxu0  ;;  %2186 = vmatprep.mubr.bf16.mxu1 %v1923_v57 }
 0x2ac   : > { %v1810_v1 = vadd.f32 %v1809_v0, %v3814_v62  ;;  %v1811_v2 = vpop.f32.mrb[119].mxu0  ;;  %2187 = vmatmul.mubr.bf16.gmra.mrb[112].mxu1 %v1922_v56  ;;  %v1886_v4 = vmax.f32 %v1806_v59, 0.0 }
 0x2ad   : > { %v1812_v3 = vadd.f32 %v1811_v2, %v3816_v63  ;;  %v1887_v6 = vmax.f32 %v1808_v61, 0.0 }
 0x2ae   : > { %v1888_v5 = vmax.f32 %v1810_v1, 0.0 }
 0x2af   : > { %v1889_v7 = vmax.f32 %v1812_v3, 0.0 }
 0x2b0   : > { %v1924_v8 = vpack.c.bf16 %v1888_v5, %v1886_v4 }
 0x2b1   : > { %v1925_v9 = vpack.c.bf16 %v1889_v7, %v1887_v6  ;;  %v1815_v10 = vpop.f32.mrb[120].mxu0 }
 0x2b2   : > { %v1816_v11 = vadd.f32 %v1815_v10, %v3814_v62  ;;  %v1817_v12 = vpop.f32.mrb[121].mxu0 }
 0x2b3   : > { %v1818_v13 = vadd.f32 %v1817_v12, %v3816_v63  ;;  %v1819_v14 = vpop.f32.mrb[122].mxu0  ;;  %2194 = vmatprep.mubr.bf16.mxu1 %v1925_v9 }
 0x2b4   : > { %v1820_v15 = vadd.f32 %v1819_v14, %v3814_v62  ;;  %v1821_v16 = vpop.f32.mrb[123].mxu0  ;;  %2195 = vmatmul.mubr.bf16.gmra.mrb[116].mxu1 %v1924_v8  ;;  %v1890_v18 = vmax.f32 %v1816_v11, 0.0 }
 0x2b5   : > { %v1822_v17 = vadd.f32 %v1821_v16, %v3816_v63  ;;  %v1891_v20 = vmax.f32 %v1818_v13, 0.0 }
 0x2b6   : > { %v1892_v19 = vmax.f32 %v1820_v15, 0.0 }
 0x2b7   : > { %v1893_v21 = vmax.f32 %v1822_v17, 0.0 }
 0x2b8   : > { %v1926_v22 = vpack.c.bf16 %v1892_v19, %v1890_v18 }
 0x2b9   : > { %v1927_v23 = vpack.c.bf16 %v1893_v21, %v1891_v20  ;;  %v1825_v24 = vpop.f32.mrb[124].mxu0 }
 0x2ba   : > { %v1826_v25 = vadd.f32 %v1825_v24, %v3814_v62  ;;  %v1827_v26 = vpop.f32.mrb[125].mxu0 }
 0x2bb   : > { %v1828_v27 = vadd.f32 %v1827_v26, %v3816_v63  ;;  %v1829_v28 = vpop.f32.mrb[126].mxu0  ;;  %2202 = vmatprep.mubr.bf16.mxu1 %v1927_v23 }
 0x2bc   : > { %v1830_v29 = vadd.f32 %v1829_v28, %v3814_v62  ;;  %v1831_v30 = vpop.f32.mrb[127].mxu0  ;;  %2203 = vmatmul.mubr.bf16.gmra.mrb[120].mxu1 %v1926_v22  ;;  %v1894_v32 = vmax.f32 %v1826_v25, 0.0 }
 0x2bd   : > { %v1832_v31 = vadd.f32 %v1831_v30, %v3816_v63  ;;  %v1895_v34 = vmax.f32 %v1828_v27, 0.0 }
 0x2be   : > { %v1896_v33 = vmax.f32 %v1830_v29, 0.0 }
 0x2bf   : > { %v1897_v35 = vmax.f32 %v1832_v31, 0.0 }
 0x2c0   : > { %v1928_v36 = vpack.c.bf16 %v1896_v33, %v1894_v32 }
 0x2c1   : > { %v1929_v37 = vpack.c.bf16 %v1897_v35, %v1895_v34 }
 0x2c3   : > { %2210 = vmatprep.mubr.bf16.mxu1 %v1929_v37 }
 0x2c4   : > { %2211 = vmatmul.mubr.bf16.gmra.mrb[124].mxu1 %v1928_v36 }
 0x31f   : > { %v3001_v38 = vpop.f32.mrb[64].mxu1 }
 0x320   : > { %v3002_v39 = vpop.f32.mrb[65].mxu1 }
 0x321   : > { %v3003_v40 = vadd.f32 %v3002_v39, %v3001_v38  ;;  %v3004_v41 = vpop.f32.mrb[66].mxu1 }
 0x322   : > { %v3005_v62 = vpop.f32.mrb[67].mxu1 }
 0x323   : > { %v3006_v42 = vadd.f32 %v3005_v62, %v3004_v41 }
 0x325   : > { %v2669_v43 = vpack.c.bf16 %v3006_v42, %v3003_v40 }
 0x327   : > { %2670 = vst [vmem:[%s3885_s27] sm:$0xff] %v2669_v43   ;;  %v3007_v63 = vpop.f32.mrb[68].mxu1 }
 0x328   : > { %v3008_v44 = vpop.f32.mrb[69].mxu1 }
 0x329   : > { %v3009_v45 = vadd.f32 %v3008_v44, %v3007_v63  ;;  %v3010_v46 = vpop.f32.mrb[70].mxu1 }
 0x32a   : > { %v3011_v47 = vpop.f32.mrb[71].mxu1 }
 0x32b   : > { %v3012_v48 = vadd.f32 %v3011_v47, %v3010_v46 }
 0x32d   : > { %v2674_v49 = vpack.c.bf16 %v3012_v48, %v3009_v45 }
 0x32f   : > { %2746 = vst [vmem:[%s3885_s27 + $0x8] sm:$0xff] %v2674_v49   ;;  %v3013_v50 = vpop.f32.mrb[72].mxu1 }
 0x330   : > { %v3014_v51 = vpop.f32.mrb[73].mxu1 }
 0x331   : > { %v3015_v52 = vadd.f32 %v3014_v51, %v3013_v50  ;;  %v3016_v53 = vpop.f32.mrb[74].mxu1 }
 0x332   : > { %v3017_v54 = vpop.f32.mrb[75].mxu1 }
 0x333   : > { %v3018_v55 = vadd.f32 %v3017_v54, %v3016_v53 }
 0x335   : > { %v2679_v56 = vpack.c.bf16 %v3018_v55, %v3015_v52 }
 0x337   : > { %2747 = vst [vmem:[%s3885_s27 + $0x10] sm:$0xff] %v2679_v56   ;;  %v3019_v57 = vpop.f32.mrb[76].mxu1 }
 0x338   : > { %v3020_v58 = vpop.f32.mrb[77].mxu1 }
 0x339   : > { %v3021_v59 = vadd.f32 %v3020_v58, %v3019_v57  ;;  %v3022_v60 = vpop.f32.mrb[78].mxu1 }
 0x33a   : > { %v3023_v61 = vpop.f32.mrb[79].mxu1 }
 0x33b   : > { %v3024_v0 = vadd.f32 %v3023_v61, %v3022_v60 }
 0x33d   : > { %v2684_v1 = vpack.c.bf16 %v3024_v0, %v3021_v59 }
 0x33f   : > { %2748 = vst [vmem:[%s3885_s27 + $0x18] sm:$0xff] %v2684_v1   ;;  %v3025_v2 = vpop.f32.mrb[80].mxu1 }
 0x340   : > { %v3026_v3 = vpop.f32.mrb[81].mxu1 }
 0x341   : > { %v3027_v4 = vadd.f32 %v3026_v3, %v3025_v2  ;;  %v3028_v5 = vpop.f32.mrb[82].mxu1 }
 0x342   : > { %v3029_v6 = vpop.f32.mrb[83].mxu1 }
 0x343   : > { %v3030_v7 = vadd.f32 %v3029_v6, %v3028_v5 }
 0x345   : > { %v2689_v8 = vpack.c.bf16 %v3030_v7, %v3027_v4 }
 0x347   : > { %2749 = vst [vmem:[%s3885_s27 + $0x20] sm:$0xff] %v2689_v8   ;;  %v3031_v9 = vpop.f32.mrb[84].mxu1 }
 0x348   : > { %v3032_v10 = vpop.f32.mrb[85].mxu1 }
 0x349   : > { %v3033_v11 = vadd.f32 %v3032_v10, %v3031_v9  ;;  %v3034_v12 = vpop.f32.mrb[86].mxu1 }
 0x34a   : > { %v3035_v13 = vpop.f32.mrb[87].mxu1 }
 0x34b   : > { %v3036_v14 = vadd.f32 %v3035_v13, %v3034_v12 }
 0x34d   : > { %v2694_v15 = vpack.c.bf16 %v3036_v14, %v3033_v11 }
 0x34f   : > { %2750 = vst [vmem:[%s3885_s27 + $0x28] sm:$0xff] %v2694_v15   ;;  %v3037_v16 = vpop.f32.mrb[88].mxu1 }
 0x350   : > { %v3038_v17 = vpop.f32.mrb[89].mxu1 }
 0x351   : > { %v3039_v18 = vadd.f32 %v3038_v17, %v3037_v16  ;;  %v3040_v19 = vpop.f32.mrb[90].mxu1 }
 0x352   : > { %v3041_v20 = vpop.f32.mrb[91].mxu1 }
 0x353   : > { %v3042_v21 = vadd.f32 %v3041_v20, %v3040_v19 }
 0x355   : > { %v2699_v22 = vpack.c.bf16 %v3042_v21, %v3039_v18 }
 0x357   : > { %2751 = vst [vmem:[%s3885_s27 + $0x30] sm:$0xff] %v2699_v22   ;;  %v3043_v23 = vpop.f32.mrb[92].mxu1 }
 0x358   : > { %v3044_v24 = vpop.f32.mrb[93].mxu1 }
 0x359   : > { %v3045_v25 = vadd.f32 %v3044_v24, %v3043_v23  ;;  %v3046_v26 = vpop.f32.mrb[94].mxu1 }
 0x35a   : > { %v3047_v27 = vpop.f32.mrb[95].mxu1 }
 0x35b   : > { %v3048_v28 = vadd.f32 %v3047_v27, %v3046_v26 }
 0x35d   : > { %v2704_v29 = vpack.c.bf16 %v3048_v28, %v3045_v25 }
 0x35f   : > { %2752 = vst [vmem:[%s3885_s27 + $0x38] sm:$0xff] %v2704_v29   ;;  %v3049_v30 = vpop.f32.mrb[96].mxu1 }
 0x360   : > { %v3050_v31 = vpop.f32.mrb[97].mxu1 }
 0x361   : > { %v3051_v32 = vadd.f32 %v3050_v31, %v3049_v30  ;;  %v3052_v33 = vpop.f32.mrb[98].mxu1 }
 0x362   : > { %v3053_v34 = vpop.f32.mrb[99].mxu1 }
 0x363   : > { %v3054_v35 = vadd.f32 %v3053_v34, %v3052_v33 }
 0x365   : > { %v2709_v36 = vpack.c.bf16 %v3054_v35, %v3051_v32 }
 0x367   : > { %2753 = vst [vmem:[%s3885_s27 + $0x40] sm:$0xff] %v2709_v36   ;;  %v3055_v37 = vpop.f32.mrb[100].mxu1 }
 0x368   : > { %v3056_v38 = vpop.f32.mrb[101].mxu1 }
 0x369   : > { %v3057_v39 = vadd.f32 %v3056_v38, %v3055_v37  ;;  %v3058_v40 = vpop.f32.mrb[102].mxu1 }
 0x36a   : > { %v3059_v41 = vpop.f32.mrb[103].mxu1 }
 0x36b   : > { %v3060_v62 = vadd.f32 %v3059_v41, %v3058_v40 }
 0x36d   : > { %v2714_v42 = vpack.c.bf16 %v3060_v62, %v3057_v39 }
 0x36f   : > { %2754 = vst [vmem:[%s3885_s27 + $0x48] sm:$0xff] %v2714_v42   ;;  %v3061_v43 = vpop.f32.mrb[104].mxu1 }
 0x370   : > { %v3062_v63 = vpop.f32.mrb[105].mxu1 }
 0x371   : > { %v3063_v44 = vadd.f32 %v3062_v63, %v3061_v43  ;;  %v3064_v45 = vpop.f32.mrb[106].mxu1 }
 0x372   : > { %v3065_v46 = vpop.f32.mrb[107].mxu1 }
 0x373   : > { %v3066_v47 = vadd.f32 %v3065_v46, %v3064_v45 }
 0x375   : > { %v2719_v48 = vpack.c.bf16 %v3066_v47, %v3063_v44 }
 0x377   : > { %2755 = vst [vmem:[%s3885_s27 + $0x50] sm:$0xff] %v2719_v48   ;;  %v3067_v49 = vpop.f32.mrb[108].mxu1 }
 0x378   : > { %v3068_v50 = vpop.f32.mrb[109].mxu1 }
 0x379   : > { %v3069_v51 = vadd.f32 %v3068_v50, %v3067_v49  ;;  %v3070_v52 = vpop.f32.mrb[110].mxu1 }
 0x37a   : > { %v3071_v53 = vpop.f32.mrb[111].mxu1 }
 0x37b   : > { %v3072_v54 = vadd.f32 %v3071_v53, %v3070_v52 }
 0x37d   : > { %v2724_v55 = vpack.c.bf16 %v3072_v54, %v3069_v51 }
 0x37f   : > { %2756 = vst [vmem:[%s3885_s27 + $0x58] sm:$0xff] %v2724_v55   ;;  %v3073_v56 = vpop.f32.mrb[112].mxu1 }
 0x380   : > { %v3074_v57 = vpop.f32.mrb[113].mxu1 }
 0x381   : > { %v3075_v58 = vadd.f32 %v3074_v57, %v3073_v56  ;;  %v3076_v59 = vpop.f32.mrb[114].mxu1 }
 0x382   : > { %v3077_v60 = vpop.f32.mrb[115].mxu1 }
 0x383   : > { %v3078_v61 = vadd.f32 %v3077_v60, %v3076_v59 }
 0x385   : > { %v2729_v0 = vpack.c.bf16 %v3078_v61, %v3075_v58 }
 0x387   : > { %2757 = vst [vmem:[%s3885_s27 + $0x60] sm:$0xff] %v2729_v0   ;;  %v3079_v1 = vpop.f32.mrb[116].mxu1 }
 0x388   : > { %v3080_v2 = vpop.f32.mrb[117].mxu1 }
 0x389   : > { %v3081_v3 = vadd.f32 %v3080_v2, %v3079_v1  ;;  %v3082_v4 = vpop.f32.mrb[118].mxu1 }
 0x38a   : > { %v3083_v5 = vpop.f32.mrb[119].mxu1 }
 0x38b   : > { %v3084_v6 = vadd.f32 %v3083_v5, %v3082_v4 }
 0x38d   : > { %v2734_v7 = vpack.c.bf16 %v3084_v6, %v3081_v3 }
 0x38f   : > { %2758 = vst [vmem:[%s3885_s27 + $0x68] sm:$0xff] %v2734_v7   ;;  %v3085_v8 = vpop.f32.mrb[120].mxu1 }
 0x390   : > { %v3086_v9 = vpop.f32.mrb[121].mxu1 }
 0x391   : > { %v3087_v10 = vadd.f32 %v3086_v9, %v3085_v8  ;;  %v3088_v11 = vpop.f32.mrb[122].mxu1 }
 0x392   : > { %v3089_v12 = vpop.f32.mrb[123].mxu1 }
 0x393   : > { %v3090_v13 = vadd.f32 %v3089_v12, %v3088_v11 }
 0x395   : > { %v2739_v14 = vpack.c.bf16 %v3090_v13, %v3087_v10 }
 0x397   : > { %2759 = vst [vmem:[%s3885_s27 + $0x70] sm:$0xff] %v2739_v14   ;;  %v3091_v15 = vpop.f32.mrb[124].mxu1 }
 0x398   : > { %v3092_v16 = vpop.f32.mrb[125].mxu1 }
 0x399   : > { %v3093_v17 = vadd.f32 %v3092_v16, %v3091_v15  ;;  %v3094_v18 = vpop.f32.mrb[126].mxu1 }
 0x39a   : > { %v3095_v19 = vpop.f32.mrb[127].mxu1 }
 0x39b   : > { %v3096_v20 = vadd.f32 %v3095_v19, %v3094_v18 }
 0x39d   : > { %v2744_v21 = vpack.c.bf16 %v3096_v20, %v3093_v17 }
 0x39f   : > { %2760 = vst [vmem:[%s3885_s27 + $0x78] sm:$0xff] %v2744_v21  }
 0x3a0   : > { %3425 = shalt.err (!%p3422_p7)
}
 0x3a1   : > { %s3426_s29 = scalar_lea.hbm %s3907_s11, 2048  ;;  %s3430_s20 = scalar_lea.hbm %s3966_s6, 4096 }
 0x3a2   : > { %p3427_p9 = scmp.ne.s32.totalorder %s3907_s11, %s3426_s29  ;;  %p3431_p8 = scmp.lt.u32.totalorder %s3907_s11, %s3966_s6 }
 0x3a3   : > { %p3432_p13 = scmp.lt.u32.totalorder %s3430_s20, %s3426_s29  ;;  %p3434_p10 = scmp.lt.u32.totalorder %s3426_s29, %s3907_s11 }
 0x3a4   : > { %p3428_p12 = pnand %p3427_p9, %p3986_p11 }
 0x3a5   : > { %p3433_p1 = por %p3432_p13, %p3431_p8 }
 0x3a6   : > { %p3429_p4 = pneg %p3428_p12 }
 0x3a7   : > { %p3435_p0 = por %p3434_p10, %p3433_p1 }
 0x3a9   : > { %p3436_p2 = pnand %p3435_p0, %p3429_p4 }
 0x3ab   : > { %3439 = shalt.err (!%p3436_p2)
}
 0x3ac   : > { %s3509_s13 = smov 64   ;;  %s3510_s16 = smov 4  }
 0x3ad   : > { %3109 = dma.vmem_to_hbm [thread:$0]  (%p3986_p11), %s3909_s10, 2048, %s3907_s11, %s3914_s12, %s3509_s13, %s3509_s13, %s3510_s16  }
 0x3ae PF: > { %p3131_p3 = scmp.ge.s32.totalorder %s3498_s26, 2  ;;  %s2408_s27 = sand.u32 1, %s3478_s21  }
 0x3af   : > { %p3987_p5 = scmp.ne.s32.totalorder %s3977_s9, 0  ;;  %s2409_s17 = scalar_lea.sflag [#allocation5], %s2408_s27 }
 0x3b1   : > { %p3122_p6 = pnand %p3131_p3, %p3987_p5 }
 0x3b3   : > { %3473 = dma.done.wait (!%p3122_p6), %s2409_s17, 2048  }
 0x3b4   : > { %3475 = vsyncadd (!%p3122_p6), %s2409_s17, 4294965248  ;;  %s21_s26 = sadd.s32 1, %s3498_s26   ;;  %s3988_s14 = sld [smem:[#allocation15_spill]] }
 0x3b5   : > { %p18_p7 = scmp.ge.s32.totalorder %s21_s26, 4   ;;  %s3989_s24 = sld [smem:[#allocation13_spill]] }
 0x3b6   : > { %s3990_s25 = sld [smem:[#allocation14_spill]]  ;;  %s3991_s21 = smov %s3482_s22 }
 0x3b7   : > { %s3992_s22 = smov %s3486_s23  ;;  %20 = sbr.rel (!%p18_p7) target bundleno = 8 (0x8), region = 104 }
 0x3ba   : > { %s3993_s23 = smov %s3988_s14 }
 0x3be   :  { %2414 = vsyncpa [#allocation4], 1 }
 0x3bf   :  { %2416 = vsyncpa [#allocation4 + $0x1], 1 }
 0x3c0   :  { %2417 = vsyncpa [#allocation7], 1 }
 0x3c1   :  { %2418 = vsyncpa [#allocation5], 1 }
 0x3c2   :  { %2420 = vsyncpa [#allocation5 + $0x1], 1 }

</bundles_post_ra>
